<compile_context>
chip_gen: v7x
topology: tpu7x:2x2x1
jax: 0.10.0
libtpu: 0.0.40
codegen_flags: <defaults>
</compile_context>

<pallas_src>
import functools

import jax
import jax.numpy as jnp
from jax.experimental import pallas as pl
from jax.experimental.pallas import tpu as pltpu


# ----------------------------------------------------------------------------
# Fused Pallas kernel (single grid step, everything resident in VMEM):
#   upsample(x1) folded into conv1x1 -> BN -> LReLU
#   -> conv3x3 (roll-based taps)     -> BN -> LReLU
#   -> conv1x1                       -> BN -> LReLU
# All activations are channel-major (C, P); P = N*H*W is lane-dense.
# ----------------------------------------------------------------------------
def _fused_upsample_block_kernel(
        x2_ref,          # (N, C2, HW)   skip connection, per-image channel-major
        x1_ref,          # (N, C1, HW1)  low-res input, per-image channel-major
        mt_ref,          # (HW1, HW)     (bilinear 2x upsample + zero pad)^T
        w1a_ref,         # (Ci, C2)      conv1 rows multiplying x2 (transposed)
        w1b_ref,         # (Ci, C1)      conv1 rows multiplying up(x1)
        w2t_ref,         # (9, Ci, Ci)   conv2 taps, [ky*3+kx, cout, cin]
        w3t_ref,         # (Co, Ci)      conv3 (transposed)
        g1_ref, b1_ref,  # (Ci, 1)
        g2_ref, b2_ref,  # (Ci, 1)
        g3_ref, b3_ref,  # (Co, 1)
        mask_ref,        # (4, P) f32 rows: [y>0, y<H-1, x>0, x<W-1]
        out_ref,         # (N, Co, HW)   channel-major per image == flat NCHW
        *, N, H, W):
    Ci = w1a_ref.shape[0]
    HW = H * W
    P = N * HW
    eps = 1e-5
    slope = 0.1

    def bn_lrelu(z, g_ref, b_ref):
        # Training-mode BatchNorm over the pixel (lane) axis, mean-subtracted
        # second pass, fused with LeakyReLU(0.1).  Lane reductions -> XLU.
        mean = jnp.mean(z, axis=1, keepdims=True)
        zc = z - mean
        var = jnp.mean(zc * zc, axis=1, keepdims=True)
        y = zc * (g_ref[...] * jax.lax.rsqrt(var + eps)) + b_ref[...]
        return jnp.where(y > 0.0, y, slope * y)

    # ---- stage 1: 1x1 conv on the (virtual) concat [x2, up(x1)] -------------
    # conv1 is linear, so project x1's channels first (C1 -> Ci, tiny) and
    # then upsample+pad spatially with the fixed interpolation matrix M^T.
    mt = mt_ref[...]
    parts = []
    for n in range(N):
        z_skip = jnp.dot(w1a_ref[...], x2_ref[n, :, :],
                         preferred_element_type=jnp.float32)      # (Ci, HW)
        proj = jnp.dot(w1b_ref[...], x1_ref[n, :, :],
                       preferred_element_type=jnp.float32)        # (Ci, HW1)
        z_up = jnp.dot(proj, mt,
                       preferred_element_type=jnp.float32)        # (Ci, HW)
        parts.append(z_skip + z_up)
    z1 = parts[0] if N == 1 else jnp.concatenate(parts, axis=1)   # (Ci, P)
    a1 = bn_lrelu(z1, g1_ref, b1_ref)

    # ---- stage 2: 3x3 conv, padding=1, via lane rolls + boundary masks ------
    # tap(dy,dx)[p] = a1[p + dy*W + dx]; the four (1, P) masks zero any tap
    # that would cross a row / image boundary (this also kills the circular
    # wrap-around of the rolls), reproducing the zero padding exactly.
    m_top = mask_ref[0:1, :]       # y > 0       (needed for dy = -1)
    m_bot = mask_ref[1:2, :]       # y < H - 1   (needed for dy = +1)
    m_left = mask_ref[2:3, :]      # x > 0       (needed for dx = -1)
    m_right = mask_ref[3:4, :]     # x < W - 1   (needed for dx = +1)
    row_mask = {-1: m_top, 0: None, 1: m_bot}
    col_mask = {-1: m_left, 0: None, 1: m_right}

    z2 = None
    tap_idx = 0
    for dy in (-1, 0, 1):
        for dx in (-1, 0, 1):
            off = dy * W + dx
            tap = a1 if off == 0 else pltpu.roll(a1, (-off) % P, axis=1)
            rm, cm = row_mask[dy], col_mask[dx]
            if rm is not None and cm is not None:
                tap = tap * (rm * cm)
            elif rm is not None:
                tap = tap * rm
            elif cm is not None:
                tap = tap * cm
            contrib = jnp.dot(w2t_ref[tap_idx], tap,
                              preferred_element_type=jnp.float32)  # (Ci, P)
            z2 = contrib if z2 is None else z2 + contrib
            tap_idx += 1
    a2 = bn_lrelu(z2, g2_ref, b2_ref)

    # ---- stage 3: final 1x1 conv; lane-dense per-image store, no transpose --
    z3 = jnp.dot(w3t_ref[...], a2, preferred_element_type=jnp.float32)
    a3 = bn_lrelu(z3, g3_ref, b3_ref)                             # (Co, P)
    for n in range(N):
        out_ref[n, :, :] = a3[:, n * HW:(n + 1) * HW]             # HW % 128 == 0


def _full_spec(shape):
    zeros = (0,) * len(shape)
    return pl.BlockSpec(shape, lambda i, _z=zeros: _z)


# ----------------------------------------------------------------------------
# Host-side constants (interpolation matrix, masks) and the pallas_call wrapper
# ----------------------------------------------------------------------------
def _upsample_indices(n):
    # PyTorch bilinear, align_corners=False, scale_factor=2
    src = (jnp.arange(2 * n, dtype=jnp.float32) + 0.5) / 2.0 - 0.5
    src = jnp.maximum(src, 0.0)
    i0 = jnp.floor(src).astype(jnp.int32)
    i1 = jnp.minimum(i0 + 1, n - 1)
    w1 = src - i0.astype(jnp.float32)
    return i0, i1, 1.0 - w1, w1


def _upsample_matrix(n):
    """(2n, n) matrix performing PyTorch bilinear 2x upsample along one axis."""
    i0, i1, a0, a1 = _upsample_indices(n)
    eye = jnp.eye(n, dtype=jnp.float32)
    return a0[:, None] * eye[i0] + a1[:, None] * eye[i1]


def fused_upsample_block(x1, x2, params):
    """x1: (N,C1,H1,W1), x2: (N,C2,H2,W2), both NCHW -> NCHW output."""
    N, C1, H1, W1 = x1.shape
    N2, C2, H2, W2 = x2.shape
    assert N == N2
    Ci = params['w1'].shape[1]
    Co = params['w3'].shape[1]
    assert params['w1'].shape[0] == C1 + C2, "conv1 expects concat([x2, up(x1)])"
    HW1, HW = H1 * W1, H2 * W2
    # Lane-dense guarantee: every per-image pixel slab is a multiple of 128
    # lanes, so all in-kernel loads/stores stay unmasked dense vectors.
    assert HW % 128 == 0, f"H2*W2={HW} must be a multiple of 128"
    dY, dX = H2 - 2 * H1, W2 - 2 * W1
    assert dY >= 0 and dX >= 0

    # Fixed (bilinear 2x upsample + zero pad) interpolation matrix, transposed.
    uh = jnp.zeros((H2, H1), jnp.float32).at[dY // 2:dY // 2 + 2 * H1].set(
        _upsample_matrix(H1))
    uw = jnp.zeros((W2, W1), jnp.float32).at[dX // 2:dX // 2 + 2 * W1].set(
        _upsample_matrix(W1))
    mt = jnp.kron(uh, uw).T                                    # (HW1, HW)

    # Boundary masks for the roll-based 3x3 taps, repeated per image.
    pix = jnp.arange(HW, dtype=jnp.int32)
    yy, xx = pix // W2, pix % W2
    masks = jnp.tile(
        jnp.stack([yy > 0, yy < H2 - 1, xx > 0, xx < W2 - 1]
                  ).astype(jnp.float32), (1, N))               # (4, N*HW)

    # Weights pre-transposed for channel-major z = W^T @ X.
    w1a_t = params['w1'][:C2].T                                # (Ci, C2)
    w1b_t = params['w1'][C2:].T                                # (Ci, C1)
    w2t = jnp.transpose(params['w2_hwio'], (0, 1, 3, 2)).reshape(9, Ci, Ci)
    w3t = params['w3'].T                                       # (Co, Ci)
    col = lambda v: v.reshape(-1, 1)

    args = [
        x2.reshape(N, C2, HW),      # free reshape (NCHW is row-major)
        x1.reshape(N, C1, HW1),     # free reshape
        mt, w1a_t, w1b_t, w2t, w3t,
        col(params['g1']), col(params['b1']),
        col(params['g2']), col(params['b2']),
        col(params['g3']), col(params['b3']),
        masks,
    ]
    kernel = functools.partial(_fused_upsample_block_kernel, N=N, H=H2, W=W2)
    out = pl.pallas_call(
        kernel,
        grid=(1,),
        in_specs=[_full_spec(a.shape) for a in args],
        out_specs=_full_spec((N, Co, HW)),
        out_shape=jax.ShapeDtypeStruct((N, Co, HW), jnp.float32),
        compiler_params=pltpu.CompilerParams(
            dimension_semantics=("arbitrary",),
            vmem_limit_bytes=32 * 1024 * 1024,
        ),
    )(*args)
    return out.reshape(N, Co, H2, W2)                          # free reshape


@jax.jit
def upsample_forward(x1, x2, params):
    return fused_upsample_block(x1, x2, params)


# ----------------------------------------------------------------------------
# Pure-JAX reference (for verification)
# ----------------------------------------------------------------------------
def upsample2x_nhwc(x):
    N, H, W, C = x.shape
    i0, i1, a0, a1 = _upsample_indices(H)
    xh = x[:, i0] * a0[None, :, None, None] + x[:, i1] * a1[None, :, None, None]
    j0, j1, b0, b1 = _upsample_indices(W)
    return xh[:, :, j0] * b0[None, None, :, None] + xh[:, :, j1] * b1[None, None, :, None]


def reference_forward(x1, x2, params):
    x1 = jnp.transpose(x1, (0, 2, 3, 1))
    x2 = jnp.transpose(x2, (0, 2, 3, 1))
    x1u = upsample2x_nhwc(x1)
    dY = x2.shape[1] - x1u.shape[1]
    dX = x2.shape[2] - x1u.shape[2]
    x1u = jnp.pad(x1u, ((0, 0), (dY // 2, dY - dY // 2),
                        (dX // 2, dX - dX // 2), (0, 0)))
    x = jnp.concatenate([x2, x1u], axis=-1)

    def bn_lrelu_ref(z, g, b):
        mean = jnp.mean(z, axis=(0, 1, 2), keepdims=True)
        var = jnp.mean((z - mean) ** 2, axis=(0, 1, 2), keepdims=True)
        y = g * (z - mean) * jax.lax.rsqrt(var + 1e-5) + b
        return jnp.where(y > 0, y, 0.1 * y)

    hp = jax.lax.Precision.HIGHEST
    z1 = jnp.einsum('nhwc,cd->nhwd', x, params['w1'], precision=hp)
    a1 = bn_lrelu_ref(z1, params['g1'], params['b1'])
    z2 = jax.lax.conv_general_dilated(
        a1, params['w2_hwio'], (1, 1), 'SAME',
        dimension_numbers=('NHWC', 'HWIO', 'NHWC'), precision=hp)
    a2 = bn_lrelu_ref(z2, params['g2'], params['b2'])
    z3 = jnp.einsum('nhwc,cd->nhwd', a2, params['w3'], precision=hp)
    a3 = bn_lrelu_ref(z3, params['g3'], params['b3'])
    return jnp.transpose(a3, (0, 3, 1, 2))


# ----------------------------------------------------------------------------
# Main
# ----------------------------------------------------------------------------
if __name__ == "__main__":
    key = jax.random.PRNGKey(0)
    keys = jax.random.split(key, 11)

    N = 2
    C1, C2 = 16, 16                 # x1 channels (low-res), x2 channels (skip)
    H1 = W1 = 8
    H2 = W2 = 16
    in_channels = C1 + C2           # channels after concat
    proj_ratio = 4
    inter = in_channels // proj_ratio   # 8
    out_channels = 16

    x1 = jax.random.normal(keys[0], (N, C1, H1, W1), jnp.float32)
    x2 = jax.random.normal(keys[1], (N, C2, H2, W2), jnp.float32)

    params = {
        'w1': 0.2 * jax.random.normal(keys[2], (in_channels, inter), jnp.float32),
        'w2_hwio': 0.2 * jax.random.normal(keys[3], (3, 3, inter, inter), jnp.float32),
        'w3': 0.2 * jax.random.normal(keys[4], (inter, out_channels), jnp.float32),
        'g1': 1.0 + 0.1 * jax.random.normal(keys[5], (inter,), jnp.float32),
        'b1': 0.1 * jax.random.normal(keys[6], (inter,), jnp.float32),
        'g2': 1.0 + 0.1 * jax.random.normal(keys[7], (inter,), jnp.float32),
        'b2': 0.1 * jax.random.normal(keys[8], (inter,), jnp.float32),
        'g3': 1.0 + 0.1 * jax.random.normal(keys[9], (out_channels,), jnp.float32),
        'b3': 0.1 * jax.random.normal(keys[10], (out_channels,), jnp.float32),
    }

    out = jax.block_until_ready(upsample_forward(x1, x2, params))
    ref = jax.block_until_ready(reference_forward(x1, x2, params))

    assert out.shape == (N, out_channels, H2, W2), out.shape
    max_err = float(jnp.max(jnp.abs(out - ref)))
    assert jnp.allclose(out, ref, rtol=1e-2, atol=1e-2), f"max abs err {max_err}"
    print("KERNEL_OK")
</pallas_src>

<mosaic_0001>
module attributes {stable_mosaic.version = 11 : i64} {
  func.func @_fused_upsample_block_kernel(%arg0: i32, %arg1: memref<2x16x256xf32, #tpu.memory_space<vmem>>, %arg2: memref<2x16x64xf32, #tpu.memory_space<vmem>>, %arg3: memref<64x256xf32, #tpu.memory_space<vmem>>, %arg4: memref<8x16xf32, #tpu.memory_space<vmem>>, %arg5: memref<8x16xf32, #tpu.memory_space<vmem>>, %arg6: memref<9x8x8xf32, #tpu.memory_space<vmem>>, %arg7: memref<16x8xf32, #tpu.memory_space<vmem>>, %arg8: memref<8x1xf32, #tpu.memory_space<vmem>>, %arg9: memref<8x1xf32, #tpu.memory_space<vmem>>, %arg10: memref<8x1xf32, #tpu.memory_space<vmem>>, %arg11: memref<8x1xf32, #tpu.memory_space<vmem>>, %arg12: memref<16x1xf32, #tpu.memory_space<vmem>>, %arg13: memref<16x1xf32, #tpu.memory_space<vmem>>, %arg14: memref<4x512xf32, #tpu.memory_space<vmem>>, %arg15: memref<2x16x256xf32, #tpu.memory_space<vmem>>) attributes {dimension_semantics = [#tpu.dimension_semantics<arbitrary>], iteration_bounds = array<i64: 1>, scalar_prefetch = 0 : i64, scratch_operands = 0 : i64, tpu.core_type = #tpu.core_type<tc>, window_params = [{pipeline_mode = #tpu.pipeline_mode<synchronous>, transform_indices = @transform_0, window_bounds = array<i64: 2, 16, 256>}, {pipeline_mode = #tpu.pipeline_mode<synchronous>, transform_indices = @transform_1, window_bounds = array<i64: 2, 16, 64>}, {pipeline_mode = #tpu.pipeline_mode<synchronous>, transform_indices = @transform_2, window_bounds = array<i64: 64, 256>}, {pipeline_mode = #tpu.pipeline_mode<synchronous>, transform_indices = @transform_3, window_bounds = array<i64: 8, 16>}, {pipeline_mode = #tpu.pipeline_mode<synchronous>, transform_indices = @transform_4, window_bounds = array<i64: 8, 16>}, {pipeline_mode = #tpu.pipeline_mode<synchronous>, transform_indices = @transform_5, window_bounds = array<i64: 9, 8, 8>}, {pipeline_mode = #tpu.pipeline_mode<synchronous>, transform_indices = @transform_6, window_bounds = array<i64: 16, 8>}, {pipeline_mode = #tpu.pipeline_mode<synchronous>, transform_indices = @transform_7, window_bounds = array<i64: 8, 1>}, {pipeline_mode = #tpu.pipeline_mode<synchronous>, transform_indices = @transform_8, window_bounds = array<i64: 8, 1>}, {pipeline_mode = #tpu.pipeline_mode<synchronous>, transform_indices = @transform_9, window_bounds = array<i64: 8, 1>}, {pipeline_mode = #tpu.pipeline_mode<synchronous>, transform_indices = @transform_10, window_bounds = array<i64: 8, 1>}, {pipeline_mode = #tpu.pipeline_mode<synchronous>, transform_indices = @transform_11, window_bounds = array<i64: 16, 1>}, {pipeline_mode = #tpu.pipeline_mode<synchronous>, transform_indices = @transform_12, window_bounds = array<i64: 16, 1>}, {pipeline_mode = #tpu.pipeline_mode<synchronous>, transform_indices = @transform_13, window_bounds = array<i64: 4, 512>}, {pipeline_mode = #tpu.pipeline_mode<synchronous>, transform_indices = @transform_14, window_bounds = array<i64: 2, 16, 256>}]} {
    %c0 = arith.constant 0 : index
    %c0_0 = arith.constant 0 : index
    %0 = vector.load %arg3[%c0, %c0_0] : memref<64x256xf32, #tpu.memory_space<vmem>>, vector<64x256xf32>
    %c0_1 = arith.constant 0 : index
    %c0_2 = arith.constant 0 : index
    %1 = vector.load %arg4[%c0_1, %c0_2] : memref<8x16xf32, #tpu.memory_space<vmem>>, vector<8x16xf32>
    %c0_3 = arith.constant 0 : index
    %c0_4 = arith.constant 0 : index
    %c0_5 = arith.constant 0 : index
    %2 = vector.load %arg1[%c0_3, %c0_4, %c0_5] : memref<2x16x256xf32, #tpu.memory_space<vmem>>, vector<1x16x256xf32>
    %3 = vector.shape_cast %2 : vector<1x16x256xf32> to vector<16x256xf32>
    %cst = arith.constant dense<0.000000e+00> : vector<8x256xf32>
    %4 = tpu.matmul %1, %3, %cst {dimension_numbers = #tpu.dot_dimension_numbers<[1], [0], [0], [1], [0, 0, 1, 1], [], []>} : vector<8x16xf32>, vector<16x256xf32>, vector<8x256xf32> -> vector<8x256xf32>
    %c0_6 = arith.constant 0 : index
    %c0_7 = arith.constant 0 : index
    %5 = vector.load %arg5[%c0_6, %c0_7] : memref<8x16xf32, #tpu.memory_space<vmem>>, vector<8x16xf32>
    %c0_8 = arith.constant 0 : index
    %c0_9 = arith.constant 0 : index
    %c0_10 = arith.constant 0 : index
    %6 = vector.load %arg2[%c0_8, %c0_9, %c0_10] : memref<2x16x64xf32, #tpu.memory_space<vmem>>, vector<1x16x64xf32>
    %7 = vector.shape_cast %6 : vector<1x16x64xf32> to vector<16x64xf32>
    %cst_11 = arith.constant dense<0.000000e+00> : vector<8x64xf32>
    %8 = tpu.matmul %5, %7, %cst_11 {dimension_numbers = #tpu.dot_dimension_numbers<[1], [0], [0], [1], [0, 0, 1, 1], [], []>} : vector<8x16xf32>, vector<16x64xf32>, vector<8x64xf32> -> vector<8x64xf32>
    %cst_12 = arith.constant dense<0.000000e+00> : vector<8x256xf32>
    %9 = tpu.matmul %8, %0, %cst_12 {dimension_numbers = #tpu.dot_dimension_numbers<[1], [0], [0], [1], [0, 0, 1, 1], [], []>} : vector<8x64xf32>, vector<64x256xf32>, vector<8x256xf32> -> vector<8x256xf32>
    %10 = arith.addf %4, %9 : vector<8x256xf32>
    %c0_13 = arith.constant 0 : index
    %c0_14 = arith.constant 0 : index
    %11 = vector.load %arg4[%c0_13, %c0_14] : memref<8x16xf32, #tpu.memory_space<vmem>>, vector<8x16xf32>
    %c1 = arith.constant 1 : index
    %c0_15 = arith.constant 0 : index
    %c0_16 = arith.constant 0 : index
    %12 = vector.load %arg1[%c1, %c0_15, %c0_16] : memref<2x16x256xf32, #tpu.memory_space<vmem>>, vector<1x16x256xf32>
    %13 = vector.shape_cast %12 : vector<1x16x256xf32> to vector<16x256xf32>
    %cst_17 = arith.constant dense<0.000000e+00> : vector<8x256xf32>
    %14 = tpu.matmul %11, %13, %cst_17 {dimension_numbers = #tpu.dot_dimension_numbers<[1], [0], [0], [1], [0, 0, 1, 1], [], []>} : vector<8x16xf32>, vector<16x256xf32>, vector<8x256xf32> -> vector<8x256xf32>
    %c0_18 = arith.constant 0 : index
    %c0_19 = arith.constant 0 : index
    %15 = vector.load %arg5[%c0_18, %c0_19] : memref<8x16xf32, #tpu.memory_space<vmem>>, vector<8x16xf32>
    %c1_20 = arith.constant 1 : index
    %c0_21 = arith.constant 0 : index
    %c0_22 = arith.constant 0 : index
    %16 = vector.load %arg2[%c1_20, %c0_21, %c0_22] : memref<2x16x64xf32, #tpu.memory_space<vmem>>, vector<1x16x64xf32>
    %17 = vector.shape_cast %16 : vector<1x16x64xf32> to vector<16x64xf32>
    %cst_23 = arith.constant dense<0.000000e+00> : vector<8x64xf32>
    %18 = tpu.matmul %15, %17, %cst_23 {dimension_numbers = #tpu.dot_dimension_numbers<[1], [0], [0], [1], [0, 0, 1, 1], [], []>} : vector<8x16xf32>, vector<16x64xf32>, vector<8x64xf32> -> vector<8x64xf32>
    %cst_24 = arith.constant dense<0.000000e+00> : vector<8x256xf32>
    %19 = tpu.matmul %18, %0, %cst_24 {dimension_numbers = #tpu.dot_dimension_numbers<[1], [0], [0], [1], [0, 0, 1, 1], [], []>} : vector<8x64xf32>, vector<64x256xf32>, vector<8x256xf32> -> vector<8x256xf32>
    %20 = arith.addf %14, %19 : vector<8x256xf32>
    %21 = tpu.concatenate %10, %20 in 1 : vector<8x256xf32>, vector<8x256xf32> -> vector<8x512xf32>
    %cst_25 = arith.constant dense<0.000000e+00> : vector<8xf32>
    %22 = vector.multi_reduction <add>, %21, %cst_25 [1] : vector<8x512xf32> to vector<8xf32>
    %23 = vector.shape_cast %22 : vector<8xf32> to vector<8x1xf32>
    %cst_26 = arith.constant 5.120000e+02 : f32
    %24 = vector.broadcast %cst_26 : f32 to vector<8x1xf32>
    %25 = arith.divf %23, %24 : vector<8x1xf32>
    %26 = vector.broadcast %25 : vector<8x1xf32> to vector<8x512xf32>
    %27 = arith.subf %21, %26 : vector<8x512xf32>
    %28 = arith.mulf %27, %27 : vector<8x512xf32>
    %cst_27 = arith.constant dense<0.000000e+00> : vector<8xf32>
    %29 = vector.multi_reduction <add>, %28, %cst_27 [1] : vector<8x512xf32> to vector<8xf32>
    %30 = vector.shape_cast %29 : vector<8xf32> to vector<8x1xf32>
    %cst_28 = arith.constant 5.120000e+02 : f32
    %31 = vector.broadcast %cst_28 : f32 to vector<8x1xf32>
    %32 = arith.divf %30, %31 : vector<8x1xf32>
    %c0_29 = arith.constant 0 : index
    %c0_30 = arith.constant 0 : index
    %33 = vector.load %arg8[%c0_29, %c0_30] : memref<8x1xf32, #tpu.memory_space<vmem>>, vector<8x1xf32>
    %cst_31 = arith.constant 9.99999974E-6 : f32
    %34 = vector.broadcast %cst_31 : f32 to vector<8x1xf32>
    %35 = arith.addf %32, %34 : vector<8x1xf32>
    %36 = math.rsqrt %35 : vector<8x1xf32>
    %37 = arith.mulf %33, %36 : vector<8x1xf32>
    %38 = vector.broadcast %37 : vector<8x1xf32> to vector<8x512xf32>
    %39 = arith.mulf %27, %38 : vector<8x512xf32>
    %c0_32 = arith.constant 0 : index
    %c0_33 = arith.constant 0 : index
    %40 = vector.load %arg9[%c0_32, %c0_33] : memref<8x1xf32, #tpu.memory_space<vmem>>, vector<8x1xf32>
    %41 = vector.broadcast %40 : vector<8x1xf32> to vector<8x512xf32>
    %42 = arith.addf %39, %41 : vector<8x512xf32>
    %cst_34 = arith.constant 0.000000e+00 : f32
    %43 = vector.broadcast %cst_34 : f32 to vector<8x512xf32>
    %44 = arith.cmpf ogt, %42, %43 : vector<8x512xf32>
    %cst_35 = arith.constant 1.000000e-01 : f32
    %45 = vector.broadcast %cst_35 : f32 to vector<8x512xf32>
    %46 = arith.mulf %45, %42 : vector<8x512xf32>
    %47 = arith.select %44, %42, %46 : vector<8x512xi1>, vector<8x512xf32>
    %c0_36 = arith.constant 0 : index
    %c0_37 = arith.constant 0 : index
    %48 = vector.load %arg14[%c0_36, %c0_37] : memref<4x512xf32, #tpu.memory_space<vmem>>, vector<1x512xf32>
    %c1_38 = arith.constant 1 : index
    %c0_39 = arith.constant 0 : index
    %49 = vector.load %arg14[%c1_38, %c0_39] : memref<4x512xf32, #tpu.memory_space<vmem>>, vector<1x512xf32>
    %c2 = arith.constant 2 : index
    %c0_40 = arith.constant 0 : index
    %50 = vector.load %arg14[%c2, %c0_40] : memref<4x512xf32, #tpu.memory_space<vmem>>, vector<1x512xf32>
    %c3 = arith.constant 3 : index
    %c0_41 = arith.constant 0 : index
    %51 = vector.load %arg14[%c3, %c0_41] : memref<4x512xf32, #tpu.memory_space<vmem>>, vector<1x512xf32>
    %c17_i32 = arith.constant 17 : i32
    %52 = tpu.dynamic_rotate %47 by %c17_i32 dim 1 : vector<8x512xf32>, i32 -> vector<8x512xf32>
    %53 = arith.mulf %48, %50 : vector<1x512xf32>
    %54 = vector.broadcast %53 : vector<1x512xf32> to vector<8x512xf32>
    %55 = arith.mulf %52, %54 : vector<8x512xf32>
    %c0_42 = arith.constant 0 : index
    %c0_43 = arith.constant 0 : index
    %c0_44 = arith.constant 0 : index
    %56 = vector.load %arg6[%c0_42, %c0_43, %c0_44] : memref<9x8x8xf32, #tpu.memory_space<vmem>>, vector<1x8x8xf32>
    %57 = vector.shape_cast %56 : vector<1x8x8xf32> to vector<8x8xf32>
    %cst_45 = arith.constant dense<0.000000e+00> : vector<8x512xf32>
    %58 = tpu.matmul %57, %55, %cst_45 {dimension_numbers = #tpu.dot_dimension_numbers<[1], [0], [0], [1], [0, 0, 1, 1], [], []>} : vector<8x8xf32>, vector<8x512xf32>, vector<8x512xf32> -> vector<8x512xf32>
    %c16_i32 = arith.constant 16 : i32
    %59 = tpu.dynamic_rotate %47 by %c16_i32 dim 1 : vector<8x512xf32>, i32 -> vector<8x512xf32>
    %60 = vector.broadcast %48 : vector<1x512xf32> to vector<8x512xf32>
    %61 = arith.mulf %59, %60 : vector<8x512xf32>
    %c1_46 = arith.constant 1 : index
    %c0_47 = arith.constant 0 : index
    %c0_48 = arith.constant 0 : index
    %62 = vector.load %arg6[%c1_46, %c0_47, %c0_48] : memref<9x8x8xf32, #tpu.memory_space<vmem>>, vector<1x8x8xf32>
    %63 = vector.shape_cast %62 : vector<1x8x8xf32> to vector<8x8xf32>
    %cst_49 = arith.constant dense<0.000000e+00> : vector<8x512xf32>
    %64 = tpu.matmul %63, %61, %cst_49 {dimension_numbers = #tpu.dot_dimension_numbers<[1], [0], [0], [1], [0, 0, 1, 1], [], []>} : vector<8x8xf32>, vector<8x512xf32>, vector<8x512xf32> -> vector<8x512xf32>
    %65 = arith.addf %58, %64 : vector<8x512xf32>
    %c15_i32 = arith.constant 15 : i32
    %66 = tpu.dynamic_rotate %47 by %c15_i32 dim 1 : vector<8x512xf32>, i32 -> vector<8x512xf32>
    %67 = arith.mulf %48, %51 : vector<1x512xf32>
    %68 = vector.broadcast %67 : vector<1x512xf32> to vector<8x512xf32>
    %69 = arith.mulf %66, %68 : vector<8x512xf32>
    %c2_50 = arith.constant 2 : index
    %c0_51 = arith.constant 0 : index
    %c0_52 = arith.constant 0 : index
    %70 = vector.load %arg6[%c2_50, %c0_51, %c0_52] : memref<9x8x8xf32, #tpu.memory_space<vmem>>, vector<1x8x8xf32>
    %71 = vector.shape_cast %70 : vector<1x8x8xf32> to vector<8x8xf32>
    %cst_53 = arith.constant dense<0.000000e+00> : vector<8x512xf32>
    %72 = tpu.matmul %71, %69, %cst_53 {dimension_numbers = #tpu.dot_dimension_numbers<[1], [0], [0], [1], [0, 0, 1, 1], [], []>} : vector<8x8xf32>, vector<8x512xf32>, vector<8x512xf32> -> vector<8x512xf32>
    %73 = arith.addf %65, %72 : vector<8x512xf32>
    %c1_i32 = arith.constant 1 : i32
    %74 = tpu.dynamic_rotate %47 by %c1_i32 dim 1 : vector<8x512xf32>, i32 -> vector<8x512xf32>
    %75 = vector.broadcast %50 : vector<1x512xf32> to vector<8x512xf32>
    %76 = arith.mulf %74, %75 : vector<8x512xf32>
    %c3_54 = arith.constant 3 : index
    %c0_55 = arith.constant 0 : index
    %c0_56 = arith.constant 0 : index
    %77 = vector.load %arg6[%c3_54, %c0_55, %c0_56] : memref<9x8x8xf32, #tpu.memory_space<vmem>>, vector<1x8x8xf32>
    %78 = vector.shape_cast %77 : vector<1x8x8xf32> to vector<8x8xf32>
    %cst_57 = arith.constant dense<0.000000e+00> : vector<8x512xf32>
    %79 = tpu.matmul %78, %76, %cst_57 {dimension_numbers = #tpu.dot_dimension_numbers<[1], [0], [0], [1], [0, 0, 1, 1], [], []>} : vector<8x8xf32>, vector<8x512xf32>, vector<8x512xf32> -> vector<8x512xf32>
    %80 = arith.addf %73, %79 : vector<8x512xf32>
    %c4 = arith.constant 4 : index
    %c0_58 = arith.constant 0 : index
    %c0_59 = arith.constant 0 : index
    %81 = vector.load %arg6[%c4, %c0_58, %c0_59] : memref<9x8x8xf32, #tpu.memory_space<vmem>>, vector<1x8x8xf32>
    %82 = vector.shape_cast %81 : vector<1x8x8xf32> to vector<8x8xf32>
    %cst_60 = arith.constant dense<0.000000e+00> : vector<8x512xf32>
    %83 = tpu.matmul %82, %47, %cst_60 {dimension_numbers = #tpu.dot_dimension_numbers<[1], [0], [0], [1], [0, 0, 1, 1], [], []>} : vector<8x8xf32>, vector<8x512xf32>, vector<8x512xf32> -> vector<8x512xf32>
    %84 = arith.addf %80, %83 : vector<8x512xf32>
    %c511_i32 = arith.constant 511 : i32
    %85 = tpu.dynamic_rotate %47 by %c511_i32 dim 1 : vector<8x512xf32>, i32 -> vector<8x512xf32>
    %86 = vector.broadcast %51 : vector<1x512xf32> to vector<8x512xf32>
    %87 = arith.mulf %85, %86 : vector<8x512xf32>
    %c5 = arith.constant 5 : index
    %c0_61 = arith.constant 0 : index
    %c0_62 = arith.constant 0 : index
    %88 = vector.load %arg6[%c5, %c0_61, %c0_62] : memref<9x8x8xf32, #tpu.memory_space<vmem>>, vector<1x8x8xf32>
    %89 = vector.shape_cast %88 : vector<1x8x8xf32> to vector<8x8xf32>
    %cst_63 = arith.constant dense<0.000000e+00> : vector<8x512xf32>
    %90 = tpu.matmul %89, %87, %cst_63 {dimension_numbers = #tpu.dot_dimension_numbers<[1], [0], [0], [1], [0, 0, 1, 1], [], []>} : vector<8x8xf32>, vector<8x512xf32>, vector<8x512xf32> -> vector<8x512xf32>
    %91 = arith.addf %84, %90 : vector<8x512xf32>
    %c497_i32 = arith.constant 497 : i32
    %92 = tpu.dynamic_rotate %47 by %c497_i32 dim 1 : vector<8x512xf32>, i32 -> vector<8x512xf32>
    %93 = arith.mulf %49, %50 : vector<1x512xf32>
    %94 = vector.broadcast %93 : vector<1x512xf32> to vector<8x512xf32>
    %95 = arith.mulf %92, %94 : vector<8x512xf32>
    %c6 = arith.constant 6 : index
    %c0_64 = arith.constant 0 : index
    %c0_65 = arith.constant 0 : index
    %96 = vector.load %arg6[%c6, %c0_64, %c0_65] : memref<9x8x8xf32, #tpu.memory_space<vmem>>, vector<1x8x8xf32>
    %97 = vector.shape_cast %96 : vector<1x8x8xf32> to vector<8x8xf32>
    %cst_66 = arith.constant dense<0.000000e+00> : vector<8x512xf32>
    %98 = tpu.matmul %97, %95, %cst_66 {dimension_numbers = #tpu.dot_dimension_numbers<[1], [0], [0], [1], [0, 0, 1, 1], [], []>} : vector<8x8xf32>, vector<8x512xf32>, vector<8x512xf32> -> vector<8x512xf32>
    %99 = arith.addf %91, %98 : vector<8x512xf32>
    %c496_i32 = arith.constant 496 : i32
    %100 = tpu.dynamic_rotate %47 by %c496_i32 dim 1 : vector<8x512xf32>, i32 -> vector<8x512xf32>
    %101 = vector.broadcast %49 : vector<1x512xf32> to vector<8x512xf32>
    %102 = arith.mulf %100, %101 : vector<8x512xf32>
    %c7 = arith.constant 7 : index
    %c0_67 = arith.constant 0 : index
    %c0_68 = arith.constant 0 : index
    %103 = vector.load %arg6[%c7, %c0_67, %c0_68] : memref<9x8x8xf32, #tpu.memory_space<vmem>>, vector<1x8x8xf32>
    %104 = vector.shape_cast %103 : vector<1x8x8xf32> to vector<8x8xf32>
    %cst_69 = arith.constant dense<0.000000e+00> : vector<8x512xf32>
    %105 = tpu.matmul %104, %102, %cst_69 {dimension_numbers = #tpu.dot_dimension_numbers<[1], [0], [0], [1], [0, 0, 1, 1], [], []>} : vector<8x8xf32>, vector<8x512xf32>, vector<8x512xf32> -> vector<8x512xf32>
    %106 = arith.addf %99, %105 : vector<8x512xf32>
    %c495_i32 = arith.constant 495 : i32
    %107 = tpu.dynamic_rotate %47 by %c495_i32 dim 1 : vector<8x512xf32>, i32 -> vector<8x512xf32>
    %108 = arith.mulf %49, %51 : vector<1x512xf32>
    %109 = vector.broadcast %108 : vector<1x512xf32> to vector<8x512xf32>
    %110 = arith.mulf %107, %109 : vector<8x512xf32>
    %c8 = arith.constant 8 : index
    %c0_70 = arith.constant 0 : index
    %c0_71 = arith.constant 0 : index
    %111 = vector.load %arg6[%c8, %c0_70, %c0_71] : memref<9x8x8xf32, #tpu.memory_space<vmem>>, vector<1x8x8xf32>
    %112 = vector.shape_cast %111 : vector<1x8x8xf32> to vector<8x8xf32>
    %cst_72 = arith.constant dense<0.000000e+00> : vector<8x512xf32>
    %113 = tpu.matmul %112, %110, %cst_72 {dimension_numbers = #tpu.dot_dimension_numbers<[1], [0], [0], [1], [0, 0, 1, 1], [], []>} : vector<8x8xf32>, vector<8x512xf32>, vector<8x512xf32> -> vector<8x512xf32>
    %114 = arith.addf %106, %113 : vector<8x512xf32>
    %cst_73 = arith.constant dense<0.000000e+00> : vector<8xf32>
    %115 = vector.multi_reduction <add>, %114, %cst_73 [1] : vector<8x512xf32> to vector<8xf32>
    %116 = vector.shape_cast %115 : vector<8xf32> to vector<8x1xf32>
    %cst_74 = arith.constant 5.120000e+02 : f32
    %117 = vector.broadcast %cst_74 : f32 to vector<8x1xf32>
    %118 = arith.divf %116, %117 : vector<8x1xf32>
    %119 = vector.broadcast %118 : vector<8x1xf32> to vector<8x512xf32>
    %120 = arith.subf %114, %119 : vector<8x512xf32>
    %121 = arith.mulf %120, %120 : vector<8x512xf32>
    %cst_75 = arith.constant dense<0.000000e+00> : vector<8xf32>
    %122 = vector.multi_reduction <add>, %121, %cst_75 [1] : vector<8x512xf32> to vector<8xf32>
    %123 = vector.shape_cast %122 : vector<8xf32> to vector<8x1xf32>
    %cst_76 = arith.constant 5.120000e+02 : f32
    %124 = vector.broadcast %cst_76 : f32 to vector<8x1xf32>
    %125 = arith.divf %123, %124 : vector<8x1xf32>
    %c0_77 = arith.constant 0 : index
    %c0_78 = arith.constant 0 : index
    %126 = vector.load %arg10[%c0_77, %c0_78] : memref<8x1xf32, #tpu.memory_space<vmem>>, vector<8x1xf32>
    %cst_79 = arith.constant 9.99999974E-6 : f32
    %127 = vector.broadcast %cst_79 : f32 to vector<8x1xf32>
    %128 = arith.addf %125, %127 : vector<8x1xf32>
    %129 = math.rsqrt %128 : vector<8x1xf32>
    %130 = arith.mulf %126, %129 : vector<8x1xf32>
    %131 = vector.broadcast %130 : vector<8x1xf32> to vector<8x512xf32>
    %132 = arith.mulf %120, %131 : vector<8x512xf32>
    %c0_80 = arith.constant 0 : index
    %c0_81 = arith.constant 0 : index
    %133 = vector.load %arg11[%c0_80, %c0_81] : memref<8x1xf32, #tpu.memory_space<vmem>>, vector<8x1xf32>
    %134 = vector.broadcast %133 : vector<8x1xf32> to vector<8x512xf32>
    %135 = arith.addf %132, %134 : vector<8x512xf32>
    %cst_82 = arith.constant 0.000000e+00 : f32
    %136 = vector.broadcast %cst_82 : f32 to vector<8x512xf32>
    %137 = arith.cmpf ogt, %135, %136 : vector<8x512xf32>
    %cst_83 = arith.constant 1.000000e-01 : f32
    %138 = vector.broadcast %cst_83 : f32 to vector<8x512xf32>
    %139 = arith.mulf %138, %135 : vector<8x512xf32>
    %140 = arith.select %137, %135, %139 : vector<8x512xi1>, vector<8x512xf32>
    %c0_84 = arith.constant 0 : index
    %c0_85 = arith.constant 0 : index
    %141 = vector.load %arg7[%c0_84, %c0_85] : memref<16x8xf32, #tpu.memory_space<vmem>>, vector<16x8xf32>
    %cst_86 = arith.constant dense<0.000000e+00> : vector<16x512xf32>
    %142 = tpu.matmul %141, %140, %cst_86 {dimension_numbers = #tpu.dot_dimension_numbers<[1], [0], [0], [1], [0, 0, 1, 1], [], []>} : vector<16x8xf32>, vector<8x512xf32>, vector<16x512xf32> -> vector<16x512xf32>
    %cst_87 = arith.constant dense<0.000000e+00> : vector<16xf32>
    %143 = vector.multi_reduction <add>, %142, %cst_87 [1] : vector<16x512xf32> to vector<16xf32>
    %144 = vector.shape_cast %143 : vector<16xf32> to vector<16x1xf32>
    %cst_88 = arith.constant 5.120000e+02 : f32
    %145 = vector.broadcast %cst_88 : f32 to vector<16x1xf32>
    %146 = arith.divf %144, %145 : vector<16x1xf32>
    %147 = vector.broadcast %146 : vector<16x1xf32> to vector<16x512xf32>
    %148 = arith.subf %142, %147 : vector<16x512xf32>
    %149 = arith.mulf %148, %148 : vector<16x512xf32>
    %cst_89 = arith.constant dense<0.000000e+00> : vector<16xf32>
    %150 = vector.multi_reduction <add>, %149, %cst_89 [1] : vector<16x512xf32> to vector<16xf32>
    %151 = vector.shape_cast %150 : vector<16xf32> to vector<16x1xf32>
    %cst_90 = arith.constant 5.120000e+02 : f32
    %152 = vector.broadcast %cst_90 : f32 to vector<16x1xf32>
    %153 = arith.divf %151, %152 : vector<16x1xf32>
    %c0_91 = arith.constant 0 : index
    %c0_92 = arith.constant 0 : index
    %154 = vector.load %arg12[%c0_91, %c0_92] : memref<16x1xf32, #tpu.memory_space<vmem>>, vector<16x1xf32>
    %cst_93 = arith.constant 9.99999974E-6 : f32
    %155 = vector.broadcast %cst_93 : f32 to vector<16x1xf32>
    %156 = arith.addf %153, %155 : vector<16x1xf32>
    %157 = math.rsqrt %156 : vector<16x1xf32>
    %158 = arith.mulf %154, %157 : vector<16x1xf32>
    %159 = vector.broadcast %158 : vector<16x1xf32> to vector<16x512xf32>
    %160 = arith.mulf %148, %159 : vector<16x512xf32>
    %c0_94 = arith.constant 0 : index
    %c0_95 = arith.constant 0 : index
    %161 = vector.load %arg13[%c0_94, %c0_95] : memref<16x1xf32, #tpu.memory_space<vmem>>, vector<16x1xf32>
    %162 = vector.broadcast %161 : vector<16x1xf32> to vector<16x512xf32>
    %163 = arith.addf %160, %162 : vector<16x512xf32>
    %cst_96 = arith.constant 0.000000e+00 : f32
    %164 = vector.broadcast %cst_96 : f32 to vector<16x512xf32>
    %165 = arith.cmpf ogt, %163, %164 : vector<16x512xf32>
    %cst_97 = arith.constant 1.000000e-01 : f32
    %166 = vector.broadcast %cst_97 : f32 to vector<16x512xf32>
    %167 = arith.mulf %166, %163 : vector<16x512xf32>
    %168 = arith.select %165, %163, %167 : vector<16x512xi1>, vector<16x512xf32>
    %169 = vector.extract_strided_slice %168 {offsets = [0, 0], sizes = [16, 256], strides = [1, 1]} : vector<16x512xf32> to vector<16x256xf32>
    %c0_98 = arith.constant 0 : index
    %c0_99 = arith.constant 0 : index
    %c0_100 = arith.constant 0 : index
    %170 = vector.load %arg15[%c0_98, %c0_99, %c0_100] : memref<2x16x256xf32, #tpu.memory_space<vmem>>, vector<1x16x256xf32>
    %171 = vector.shape_cast %170 : vector<1x16x256xf32> to vector<16x256xf32>
    %172 = vector.shape_cast %169 : vector<16x256xf32> to vector<1x16x256xf32>
    tpu.vector_store %arg15[%c0_98, %c0_99, %c0_100], %172 {strides = array<i32>} : memref<2x16x256xf32, #tpu.memory_space<vmem>>, vector<1x16x256xf32>,
    %173 = vector.extract_strided_slice %168 {offsets = [0, 256], sizes = [16, 256], strides = [1, 1]} : vector<16x512xf32> to vector<16x256xf32>
    %c1_101 = arith.constant 1 : index
    %c0_102 = arith.constant 0 : index
    %c0_103 = arith.constant 0 : index
    %174 = vector.load %arg15[%c1_101, %c0_102, %c0_103] : memref<2x16x256xf32, #tpu.memory_space<vmem>>, vector<1x16x256xf32>
    %175 = vector.shape_cast %174 : vector<1x16x256xf32> to vector<16x256xf32>
    %176 = vector.shape_cast %173 : vector<16x256xf32> to vector<1x16x256xf32>
    tpu.vector_store %arg15[%c1_101, %c0_102, %c0_103], %176 {strides = array<i32>} : memref<2x16x256xf32, #tpu.memory_space<vmem>>, vector<1x16x256xf32>,
    return
  }
  func.func @transform_0(%arg0: i32) -> (i32, i32, i32) {
    %c0_i32 = arith.constant 0 : i32
    %c0_i32_0 = arith.constant 0 : i32
    %c0_i32_1 = arith.constant 0 : i32
    %c0_i32_2 = arith.constant 0 : i32
    return %c0_i32, %c0_i32_0, %c0_i32_1 : i32, i32, i32
  }
  func.func @transform_1(%arg0: i32) -> (i32, i32, i32) {
    %c0_i32 = arith.constant 0 : i32
    %c0_i32_0 = arith.constant 0 : i32
    %c0_i32_1 = arith.constant 0 : i32
    %c0_i32_2 = arith.constant 0 : i32
    return %c0_i32, %c0_i32_0, %c0_i32_1 : i32, i32, i32
  }
  func.func @transform_2(%arg0: i32) -> (i32, i32) {
    %c0_i32 = arith.constant 0 : i32
    %c0_i32_0 = arith.constant 0 : i32
    %c0_i32_1 = arith.constant 0 : i32
    return %c0_i32, %c0_i32_0 : i32, i32
  }
  func.func @transform_3(%arg0: i32) -> (i32, i32) {
    %c0_i32 = arith.constant 0 : i32
    %c0_i32_0 = arith.constant 0 : i32
    %c0_i32_1 = arith.constant 0 : i32
    return %c0_i32, %c0_i32_0 : i32, i32
  }
  func.func @transform_4(%arg0: i32) -> (i32, i32) {
    %c0_i32 = arith.constant 0 : i32
    %c0_i32_0 = arith.constant 0 : i32
    %c0_i32_1 = arith.constant 0 : i32
    return %c0_i32, %c0_i32_0 : i32, i32
  }
  func.func @transform_5(%arg0: i32) -> (i32, i32, i32) {
    %c0_i32 = arith.constant 0 : i32
    %c0_i32_0 = arith.constant 0 : i32
    %c0_i32_1 = arith.constant 0 : i32
    %c0_i32_2 = arith.constant 0 : i32
    return %c0_i32, %c0_i32_0, %c0_i32_1 : i32, i32, i32
  }
  func.func @transform_6(%arg0: i32) -> (i32, i32) {
    %c0_i32 = arith.constant 0 : i32
    %c0_i32_0 = arith.constant 0 : i32
    %c0_i32_1 = arith.constant 0 : i32
    return %c0_i32, %c0_i32_0 : i32, i32
  }
  func.func @transform_7(%arg0: i32) -> (i32, i32) {
    %c0_i32 = arith.constant 0 : i32
    %c0_i32_0 = arith.constant 0 : i32
    %c0_i32_1 = arith.constant 0 : i32
    return %c0_i32, %c0_i32_0 : i32, i32
  }
  func.func @transform_8(%arg0: i32) -> (i32, i32) {
    %c0_i32 = arith.constant 0 : i32
    %c0_i32_0 = arith.constant 0 : i32
    %c0_i32_1 = arith.constant 0 : i32
    return %c0_i32, %c0_i32_0 : i32, i32
  }
  func.func @transform_9(%arg0: i32) -> (i32, i32) {
    %c0_i32 = arith.constant 0 : i32
    %c0_i32_0 = arith.constant 0 : i32
    %c0_i32_1 = arith.constant 0 : i32
    return %c0_i32, %c0_i32_0 : i32, i32
  }
  func.func @transform_10(%arg0: i32) -> (i32, i32) {
    %c0_i32 = arith.constant 0 : i32
    %c0_i32_0 = arith.constant 0 : i32
    %c0_i32_1 = arith.constant 0 : i32
    return %c0_i32, %c0_i32_0 : i32, i32
  }
  func.func @transform_11(%arg0: i32) -> (i32, i32) {
    %c0_i32 = arith.constant 0 : i32
    %c0_i32_0 = arith.constant 0 : i32
    %c0_i32_1 = arith.constant 0 : i32
    return %c0_i32, %c0_i32_0 : i32, i32
  }
  func.func @transform_12(%arg0: i32) -> (i32, i32) {
    %c0_i32 = arith.constant 0 : i32
    %c0_i32_0 = arith.constant 0 : i32
    %c0_i32_1 = arith.constant 0 : i32
    return %c0_i32, %c0_i32_0 : i32, i32
  }
  func.func @transform_13(%arg0: i32) -> (i32, i32) {
    %c0_i32 = arith.constant 0 : i32
    %c0_i32_0 = arith.constant 0 : i32
    %c0_i32_1 = arith.constant 0 : i32
    return %c0_i32, %c0_i32_0 : i32, i32
  }
  func.func @transform_14(%arg0: i32) -> (i32, i32, i32) {
    %c0_i32 = arith.constant 0 : i32
    %c0_i32_0 = arith.constant 0 : i32
    %c0_i32_1 = arith.constant 0 : i32
    %c0_i32_2 = arith.constant 0 : i32
    return %c0_i32, %c0_i32_0, %c0_i32_1 : i32, i32, i32
  }
}

</mosaic_0001>

<bundles_post_ra>
// kernel: upsample_forward.1
= control target key start
LH: loop header
LB: loop body
LE: loop exit
PB: predicated region body
PF: predicated region fallthrough
CT: control target
= control target key end

     0   :  { %v2754_v0 = vmov 0.0|0.0   ;;  %vm2755_vm0 = vmmov 0   ;;  %v2756_v3 = vmov 0.0   ;;  %vm71_vm1 = vcmask 130048   ;;  %s2761_s23 = smov 1   ;;  %s2763_s24 = smov 113   ;;  %s3329_s1 = inlined_call_operand.vmem [shape: f32[2,16,64], index: 1, kind: input, shape index: {}]   ;;  %s3330_s2 = inlined_call_operand.vmem [shape: f32[64,256], index: 2, kind: input, shape index: {}]   ;;  %s3331_s4 = inlined_call_operand.vmem [shape: f32[8,16], index: 4, kind: input, shape index: {}]   ;;  %s3332_s0 = inlined_call_operand.vmem [shape: f32[2,16,256], index: 0, kind: input, shape index: {}]   ;;  %s3333_s3 = inlined_call_operand.vmem [shape: f32[8,16], index: 3, kind: input, shape index: {}]   ;;  %s3334_s7 = inlined_call_operand.vmem [shape: f32[8,1], index: 7, kind: input, shape index: {}]   ;;  %s3335_s8 = inlined_call_operand.vmem [shape: f32[8,1], index: 8, kind: input, shape index: {}]   ;;  %s3336_s13 = inlined_call_operand.vmem [shape: f32[4,512], index: 13, kind: input, shape index: {}]   ;;  %s3337_s5 = inlined_call_operand.vmem [shape: f32[9,8,8], index: 5, kind: input, shape index: {}]   ;;  %s3338_s10 = inlined_call_operand.vmem [shape: f32[8,1], index: 10, kind: input, shape index: {}]   ;;  %s3339_s9 = inlined_call_operand.vmem [shape: f32[8,1], index: 9, kind: input, shape index: {}]   ;;  %s3340_s6 = inlined_call_operand.vmem [shape: f32[16,8], index: 6, kind: input, shape index: {}]   ;;  %s3341_s11 = inlined_call_operand.vmem [shape: f32[16,1], index: 11, kind: input, shape index: {}]   ;;  %s3342_s12 = inlined_call_operand.vmem [shape: f32[16,1], index: 12, kind: input, shape index: {}]   ;;  %s3343_s14 = inlined_call_operand.vmem [shape: f32[2,16,256], index: 14, kind: output, shape index: {}]  }
   0x1   :  { %2650 = vmatprep.subr.bf16.mxu0 %v2754_v0  ;;  %v69_v1 = vld [vmem:[%s3329_s1] sm:$0xff]  ;;  %v70_v2 = vld [vmem:[%s3329_s1 + $0x8] sm:$0xff]  ;;  %2640 = vmatprep.mubr.msk.f32.mxu0 %vm2755_vm0, %v2756_v3  ;;  %v50_v6 = vld [vmem:[%s3330_s2 + $0x18] sm:$0xff]  ;;  %vm145_vm2 = vcmask 523264   ;;  %s2764_s25 = smov 112   ;;  %s2765_s26 = smov 111  }
   0x2   :  { %v2651_v4 = vpack.c.bf16 %v70_v2, %v69_v1  ;;  %v48_v5 = vld [vmem:[%s3330_s2 + $0x8] sm:$0xff]  ;;  %v47_v7 = vld [vmem:[%s3330_s2] sm:$0xff]  ;;  %801 = vmatprep.mubr.f32.mxu1 %v2756_v3  ;;  %v49_v9 = vld [vmem:[%s3330_s2 + $0x10] sm:$0xff]  ;;  %vm662_vm8 = vcmask 64512  }
   0x3   :  { %v2653_v8 = vpack.c.bf16 %v50_v6, %v48_v5  ;;  %v52_v10 = vld [vmem:[%s3330_s2 + $0x28] sm:$0xff]  ;;  %v54_v11 = vld [vmem:[%s3330_s2 + $0x38] sm:$0xff]  ;;  %v68_v12 = vld [vmem:[%s3331_s4] sm:$0xff]  ;;  %v2655_v13 = vpack.c.bf16 %v49_v9, %v47_v7  ;;  %v2757_v7 = vmov 0   ;;  %s2760_s4 = smov 17  }
   0x4   :  { %2652 = vmatpush3.bf16.msra.mxu0 %v2651_v4  ;;  %v2657_v14 = vpack.c.bf16 %v54_v11, %v52_v10  ;;  %v51_v15 = vld [vmem:[%s3330_s2 + $0x20] sm:$0xff]  ;;  %v53_v16 = vld [vmem:[%s3330_s2 + $0x30] sm:$0xff]  ;;  %v56_v17 = vld [vmem:[%s3330_s2 + $0x48] sm:$0xff]  ;;  %2744 = vset.pattern.permute.xlu1 %v2757_v7 }
   0x5   :  { %2654 = vmatprep.subr.bf16.mxu0 %v2653_v8  ;;  %v58_v18 = vld [vmem:[%s3330_s2 + $0x58] sm:$0xff]  ;;  %v2659_v19 = vpack.c.bf16 %v53_v16, %v51_v15  ;;  %v55_v21 = vld [vmem:[%s3330_s2 + $0x40] sm:$0xff]  ;;  %v57_v22 = vld [vmem:[%s3330_s2 + $0x50] sm:$0xff]  ;;  %2745 = vset.pattern.permute.xlu0 %v2757_v7 }
   0x6   :  { %v2661_v20 = vpack.c.bf16 %v58_v18, %v56_v17  ;;  %v60_v23 = vld [vmem:[%s3330_s2 + $0x68] sm:$0xff]  ;;  %v62_v24 = vld [vmem:[%s3330_s2 + $0x78] sm:$0xff]  ;;  %v2663_v25 = vpack.c.bf16 %v57_v22, %v55_v21  ;;  %v59_v27 = vld [vmem:[%s3330_s2 + $0x60] sm:$0xff] }
   0x7   :  { %2641 = vmatmul.mubr.msk.f32.vlgmr.msra.gmra.mrb[0].mxu0 %vm71_vm1, %v68_v12  ;;  %v2665_v26 = vpack.c.bf16 %v62_v24, %v60_v23  ;;  %v61_v28 = vld [vmem:[%s3330_s2 + $0x70] sm:$0xff]  ;;  %v65_v30 = vld [vmem:[%s3332_s0 + $0x8] sm:$0xff]  ;;  %v67_v31 = vld [vmem:[%s3332_s0 + $0x18] sm:$0xff]  ;;  %s2762_s2 = smov 127  }
   0x8   :  { %2656 = vmatpush1.bf16.msra.mxu0 %v2655_v13  ;;  %213 = vmatprep.mubr.f32.mxu0 %v2756_v3  ;;  %v2667_v29 = vpack.c.bf16 %v61_v28, %v59_v27  ;;  %v2669_v32 = vpack.c.bf16 %v67_v31, %v65_v30  ;;  %v64_v33 = vld [vmem:[%s3332_s0] sm:$0xff]  ;;  %v66_v34 = vld [vmem:[%s3332_s0 + $0x10] sm:$0xff]  ;;  %v2589_v39 = vld [vmem:[%s3329_s1 + $0x18] sm:$0xff] }
   0x9   :  { %2658 = vmatprep.subr.bf16.mxu0 %v2657_v14  ;;  %v2671_v35 = vpack.c.bf16 %v66_v34, %v64_v33  ;;  %v2588_v38 = vld [vmem:[%s3329_s1 + $0x10] sm:$0xff]  ;;  %v63_v40 = vld [vmem:[%s3333_s3] sm:$0xff]  ;;  %v2585_v42 = vld [vmem:[%s3332_s0 + $0x28] sm:$0xff]  ;;  %v588_v33 = vlaneseq }
   0xa   :  { %v2674_v41 = vpack.c.bf16 %v2589_v39, %v2588_v38  ;;  %v2587_v43 = vld [vmem:[%s3332_s0 + $0x38] sm:$0xff]  ;;  %v2584_v45 = vld [vmem:[%s3332_s0 + $0x20] sm:$0xff]  ;;  %v2586_v46 = vld [vmem:[%s3332_s0 + $0x30] sm:$0xff] }
   0xb   :  { %v2692_v44 = vpack.c.bf16 %v2587_v43, %v2585_v42  ;;  %v2694_v50 = vpack.c.bf16 %v2586_v46, %v2584_v45  ;;  %v538_v11 = vld [vmem:[%s3334_s7] sm:$0xff]  ;;  %s2758_s7 = smov 16   ;;  %v598_v34 = vshrl.u32 %v588_v33, 7 }
   0xc   :  { %2660 = vmatpush1.bf16.msra.mxu0 %v2659_v19  ;;  %v3021_v46 = vld [vmem:[%s3336_s13 + $0x2] ss:$4 sm:$0xf] }
   0xd   :  { %2662 = vmatprep.subr.bf16.mxu0 %v2661_v20  ;;  %v3009_v39 = vsub.s32 2, %v598_v34 }
  0x10   :  { %2664 = vmatpush1.bf16.msra.mxu0 %v2663_v25 }
  0x11   :  { %2666 = vmatprep.subr.bf16.mxu0 %v2665_v26 }
  0x14   :  { %2668 = vmatpush1.bf16.msra.mxu0 %v2667_v29 }
  0x15   :  { %2670 = vmatprep.subr.bf16.mxu0 %v2669_v32 }
  0xda   :  { %v141_v36 = vpop.f32.mrb[0].mxu0 }
  0xdb   :  { %v2642_v37 = vpop.f32.mrb[1].mxu0  ;;  %2582 = vmatmul.mubr.msk.f32.vlgmr.msra.gmra.mrb[2].mxu0 %vm145_vm2, %v141_v36  ;;  %v2999_v36 = vsub.s32 3, %v598_v34 }
  0xdc   :  { %2672 = vmatpush1.bf16.msra.mxu0 %v2671_v35  ;;  %287 = vmatprep.mubr.f32.mxu0 %v2756_v3  ;;  %v2997_v35 = vand.u32 127, %v588_v33  ;;  %v3004_v37 = vld [vmem:[%s3336_s13] ss:$4 sm:$0xf] }
  0xdd   :  { %2673 = vmatprep.subr.bf16.mxu0 %v2754_v0  ;;  %v651_v38 = vrot.slane %v3004_v37, %v2999_v36 }
  0xde   :  { %vm630_vm7 = vcmp.lt.s32.totalorder %v2997_v35, 16  ;;  %vm590_vm9 = vcmp.lt.s32.totalorder %v2997_v35, 17  ;;  %vm961_vm10 = vcmp.lt.s32.totalorder %v2997_v35, 15  ;;  %vm1151_vm11 = vcmp.lt.s32.totalorder %v2997_v35, 1 }
  0xdf   :  { %vm1491_vm12 = vcmp.lt.s32.totalorder %v2997_v35, 127  ;;  %vm2059_vm13 = vcmp.lt.s32.totalorder %v2997_v35, 111  ;;  %vm1680_vm14 = vcmp.lt.s32.totalorder %v2997_v35, 113  ;;  %vm1870_vm15 = vcmp.lt.s32.totalorder %v2997_v35, 112 }
  0xe3   :  { %2583 = vmatmul.mubr.msk.f32.vlgmr.msra.gmra.mrb[2].mxu0 %vm71_vm1, %v63_v40 }
  0xe4   :  { %2675 = vmatpush3.bf16.msra.mxu0 %v2674_v41  ;;  %2647 = vmatprep.mubr.msk.f32.mxu0 %vm2755_vm0, %v2756_v3 }
  0xe5   :  { %2677 = vmatprep.subr.bf16.mxu0 %v2653_v8 }
  0xe7   :  { %2648 = vmatmul.mubr.msk.f32.vlgmr.msra.gmra.mrb[4].mxu0 %vm71_vm1, %v68_v12 }
  0xe8   :  { %2679 = vmatpush1.bf16.msra.mxu0 %v2655_v13  ;;  %439 = vmatprep.mubr.f32.mxu0 %v2756_v3 }
  0xe9   :  { %2681 = vmatprep.subr.bf16.mxu0 %v2657_v14  ;;  %v551_v14 = vld [vmem:[%s3335_s8] sm:$0xff]  ;;  %s2759_s8 = smov 15  }
  0xec   :  { %2683 = vmatpush1.bf16.msra.mxu0 %v2659_v19 }
  0xed   :  { %2685 = vmatprep.subr.bf16.mxu0 %v2661_v20 }
  0xf0   :  { %2687 = vmatpush1.bf16.msra.mxu0 %v2663_v25 }
  0xf1   :  { %2689 = vmatprep.subr.bf16.mxu0 %v2665_v26 }
  0xf4   :  { %2691 = vmatpush1.bf16.msra.mxu0 %v2667_v29 }
  0xf5   :  { %2693 = vmatprep.subr.bf16.mxu0 %v2692_v44  ;;  %v647_v44 = vrot.slane %v3004_v37, %v3009_v39 }
 0x1b6   :  { %v289_v47 = vpop.f32.mrb[2].mxu0 }
 0x1b7   :  { %v291_v48 = vpop.f32.mrb[3].mxu0 }
 0x1b8   :  { %v517_v49 = vadd.f32 %v291_v48, %v289_v47 }
 0x1ba   :  { %v368_v51 = vpop.f32.mrb[4].mxu0 }
 0x1bb   :  { %v2649_v52 = vpop.f32.mrb[5].mxu0  ;;  %2591 = vmatmul.mubr.msk.f32.vlgmr.msra.gmra.mrb[6].mxu0 %vm145_vm2, %v368_v51  ;;  %v3030_v51 = vsub.s32 1, %v598_v34 }
 0x1bc   :  { %2695 = vmatpush1.bf16.msra.mxu0 %v2694_v50  ;;  %510 = vmatprep.mubr.f32.mxu0 %v2756_v3  ;;  %v595_v50 = vmul.f32 %v3021_v46, %v3004_v37  ;;  %v3035_v52 = vld [vmem:[%s3337_s5 + $0x8] sm:$0xff] }
 0x1c3   :  { %2592 = vmatmul.mubr.msk.f32.vlgmr.msra.gmra.mrb[6].mxu0 %vm71_vm1, %v63_v40 }
 0x1c4   :  { %730 = vmatprep.mubr.f32.mxu0 %v2756_v3 }
 0x296   :  { %v512_v53 = vpop.f32.mrb[6].mxu0 }
 0x297   :  { %v518_v54 = vadd.f32 %v517_v49, %v512_v53  ;;  %v514_v55 = vpop.f32.mrb[7].mxu0 }
 0x299   :  { %v519_v56 = vadd.f32 %v518_v54, %v514_v55 }
 0x29b   :  { %520 = vadd.xlane.f32.xlu0 %v519_v56 }
 0x328   :  { %v521_v57 = vpop.xlane.xlu0 %520 }
 0x329   :  { %v523_v58 = vmul.f32 0.001953125, %v521_v57  ;;  %v3042_v57 = vsub.s32 0, %v598_v34 }
 0x32b   :  { %v524_v59 = vsub.f32 %v289_v47, %v523_v58  ;;  %v525_v60 = vsub.f32 %v291_v48, %v523_v58  ;;  %v526_v61 = vsub.f32 %v512_v53, %v523_v58  ;;  %v527_v62 = vsub.f32 %v514_v55, %v523_v58 }
 0x32c   :  { %v604_v55 = vrot.slane %v595_v50, %v3030_v51 }
 0x32d   :  { %v528_v63 = vmul.f32 %v524_v59, %v524_v59  ;;  %v529_v0 = vmul.f32 %v525_v60, %v525_v60  ;;  %v530_v1 = vmul.f32 %v526_v61, %v526_v61  ;;  %v531_v4 = vmul.f32 %v527_v62, %v527_v62 }
 0x32f   :  { %v532_v2 = vadd.f32 %v529_v0, %v528_v63  ;;  %v3052_v63 = vld [vmem:[%s3336_s13 + $0x3] ss:$4 sm:$0xf] }
 0x330   :  { %v966_v7 = vmul.f32 %v3052_v63, %v3004_v37 }
 0x331   :  { %v533_v5 = vadd.f32 %v532_v2, %v530_v1 }
 0x333   :  { %v534_v6 = vadd.f32 %v533_v5, %v531_v4  ;;  %v608_v4 = vrot.slane %v595_v50, %v3009_v39  ;;  %v612_v5 = vrot.slane %v595_v50, %v2999_v36 }
 0x335   :  { %535 = vadd.xlane.f32.xlu0 %v534_v6  ;;  %v621_v6 = vld [vmem:[%s3337_s5] sm:$0xff] }
 0x3c2   :  { %v536_v8 = vpop.xlane.xlu0 %535 }
 0x3c3   :  { %v537_v9 = vmul.f32 0.001953125, %v536_v8 }
 0x3c5   :  { %v539_v10 = vadd.f32 1e-05, %v537_v9 }
 0x3c7   :  { %2746 = vrsqrt.f32 %v539_v10 }
 0x3d1   :  { %v2747_v12 = vpop.eup %2746 }
 0x3d2   :  { %v541_v13 = vmul.f32 %v2747_v12, %v538_v11 }
 0x3d4   :  { %544 = vperm.xlu1 %2744, %v541_v13  }
 0x3d8   :  { %554 = vperm.xlu1 %2744, %v551_v14   ;;  %v975_v14 = vrot.slane %v966_v7, %v3030_v51 }
 0x453   :  { %v545_v15 = vpop.permute.xlu1 %544 }
 0x454   :  { %v549_v16 = vmul.f32 %v545_v15, %v526_v61  ;;  %v550_v17 = vmul.f32 %v545_v15, %v527_v62  ;;  %v547_v18 = vmul.f32 %v545_v15, %v524_v59  ;;  %v548_v20 = vmul.f32 %v545_v15, %v525_v60 }
 0x455   :  { %v600_v61 = vrot.slane %v595_v50, %v3042_v57  ;;  %v971_v15 = vrot.slane %v966_v7, %v3042_v57  ;;  %v1172_v50 = vrot.slane %v3021_v46, %v2999_v36 }
 0x457   :  { %v555_v19 = vpop.permute.xlu1 %554 }
 0x458   :  { %v559_v21 = vadd.f32 %v555_v19, %v549_v16  ;;  %v560_v22 = vadd.f32 %v555_v19, %v550_v17  ;;  %v557_v23 = vadd.f32 %v555_v19, %v547_v18  ;;  %v558_v24 = vadd.f32 %v555_v19, %v548_v20 }
 0x45a   :  { %vm563_vm3 = vcmp.gt.f32.partialorder %v559_v21, 0.0  ;;  %vm564_vm4 = vcmp.gt.f32.partialorder %v560_v22, 0.0  ;;  %v567_v25 = vmul.f32 0.1, %v559_v21  ;;  %v568_v26 = vmul.f32 0.1, %v560_v22 }
 0x45b   :  { %v565_v27 = vmul.f32 0.1, %v557_v23  ;;  %vm561_vm5 = vcmp.gt.f32.partialorder %v557_v23, 0.0  ;;  %v566_v29 = vmul.f32 0.1, %v558_v24  ;;  %vm562_vm6 = vcmp.gt.f32.partialorder %v558_v24, 0.0 }
 0x45c   :  { %v2953_v28 = vsel %vm563_vm3, %v559_v21, %v567_v25  ;;  %v2955_v30 = vsel %vm564_vm4, %v560_v22, %v568_v26  ;;  %v979_v21 = vrot.slane %v966_v7, %v3009_v39  ;;  %v983_v22 = vrot.slane %v966_v7, %v2999_v36  ;;  %v2601_v25 = vld [vmem:[%s3337_s5 + $0x10] sm:$0xff]  ;;  %v3147_v7 = vld [vmem:[%s3336_s13 + $0x1] ss:$4 sm:$0xf] }
 0x45d   :  { %626 = vrot.lane.b32.xlu0 %v2953_v28, %s2758_s7  ;;  %628 = vrot.lane.b32.xlu1 %v2955_v30, %s2758_s7  ;;  %v2961_v31 = vsel %vm561_vm5, %v557_v23, %v565_v27  ;;  %v2963_v32 = vsel %vm562_vm6, %v558_v24, %v566_v29 }
 0x461   :  { %953 = vrot.lane.b32.xlu0 %v2961_v31, %s2759_s8  ;;  %624 = vrot.lane.b32.xlu1 %v2963_v32, %s2758_s7 }
 0x465   :  { %959 = vrot.lane.b32.xlu0 %v2955_v30, %s2759_s8  ;;  %580 = vrot.lane.b32.xlu1 %v2961_v31, %s2760_s4 }
 0x469   :  { %1143 = vrot.lane.b32.xlu0 %v2961_v31, %s2761_s23  ;;  %582 = vrot.lane.b32.xlu1 %v2963_v32, %s2760_s4 }
 0x46d   :  { %1149 = vrot.lane.b32.xlu0 %v2955_v30, %s2761_s23  ;;  %586 = vrot.lane.b32.xlu1 %v2955_v30, %s2760_s4 }
 0x471   :  { %1485 = vrot.lane.b32.xlu0 %v2963_v32, %s2762_s2  ;;  %584 = vrot.lane.b32.xlu1 %v2953_v28, %s2760_s4 }
 0x475   :  { %1483 = vrot.lane.b32.xlu0 %v2961_v31, %s2762_s2  ;;  %955 = vrot.lane.b32.xlu1 %v2963_v32, %s2759_s8 }
 0x479   :  { %1674 = vrot.lane.b32.xlu0 %v2963_v32, %s2763_s24  ;;  %957 = vrot.lane.b32.xlu1 %v2953_v28, %s2759_s8 }
 0x47d   :  { %1672 = vrot.lane.b32.xlu0 %v2961_v31, %s2763_s24  ;;  %1145 = vrot.lane.b32.xlu1 %v2963_v32, %s2761_s23 }
 0x481   :  { %1864 = vrot.lane.b32.xlu0 %v2963_v32, %s2764_s25  ;;  %1147 = vrot.lane.b32.xlu1 %v2953_v28, %s2761_s23 }
 0x485   :  { %1862 = vrot.lane.b32.xlu0 %v2961_v31, %s2764_s25  ;;  %1487 = vrot.lane.b32.xlu1 %v2953_v28, %s2762_s2 }
 0x489   :  { %622 = vrot.lane.b32.xlu0 %v2961_v31, %s2758_s7  ;;  %1489 = vrot.lane.b32.xlu1 %v2955_v30, %s2762_s2 }
 0x48d   :  { %2055 = vrot.lane.b32.xlu0 %v2953_v28, %s2765_s26  ;;  %1676 = vrot.lane.b32.xlu1 %v2953_v28, %s2763_s24 }
 0x491   :  { %2057 = vrot.lane.b32.xlu0 %v2955_v30, %s2765_s26  ;;  %1678 = vrot.lane.b32.xlu1 %v2955_v30, %s2763_s24 }
 0x495   :  { %1866 = vrot.lane.b32.xlu1 %v2953_v28, %s2764_s25 }
 0x499   :  { %1868 = vrot.lane.b32.xlu1 %v2955_v30, %s2764_s25 }
 0x49d   :  { %2053 = vrot.lane.b32.xlu1 %v2963_v32, %s2765_s26 }
 0x4a1   :  { %2051 = vrot.lane.b32.xlu1 %v2961_v31, %s2765_s26 }
 0x4cf   :  { %v627_v40 = vpop.permute.xlu0 %626  ;;  %v3011_v41 = vpop.permute.xlu1 %628 }
 0x4d0   :  { %v631_v42 = vsel %vm630_vm7, %v627_v40, %v3011_v41 }
 0x4d1   :  { %v659_v43 = vmul.f32 %v651_v38, %v631_v42  ;;  %v1164_v38 = vrot.slane %v3021_v46, %v3030_v51 }
 0x4d3   :  { %v954_v45 = vpop.permute.xlu0 %953  ;;  %737 = vmatprep.subr.mxu1 %v659_v43  ;;  %v3023_v47 = vpop.permute.xlu1 %624 }
 0x4d4   :  { %v632_v48 = vsel %vm630_vm7, %v3023_v47, %v627_v40  ;;  %v1160_v40 = vrot.slane %v3021_v46, %v3042_v57 }
 0x4d5   :  { %v658_v49 = vmul.f32 %v647_v44, %v632_v48 }
 0x4d7   :  { %v960_v53 = vpop.permute.xlu0 %959  ;;  %738 = vmatpush1.msra.mxu1 %v658_v49  ;;  %v581_v54 = vpop.permute.xlu1 %580  ;;  %v1168_v49 = vrot.slane %v3021_v46, %v3009_v39 }
 0x4d8   :  { %2598 = vmatmul.mubr.msk.f32.vlgmr.msra.gmra.mrb[0].mxu1 %vm662_vm8, %v3035_v52  ;;  %v965_v17 = vsel %vm961_vm10, %v960_v53, %v954_v45 }
 0x4d9   :  { %875 = vmatprep.mubr.f32.mxu1 %v2756_v3  ;;  %v988_v23 = vmul.f32 %v971_v15, %v965_v17  ;;  %v1685_v17 = vmul.f32 %v3021_v46, %v3147_v7 }
 0x4db   :  { %v1144_v56 = vpop.permute.xlu0 %1143  ;;  %v583_v58 = vpop.permute.xlu1 %582 }
 0x4dc   :  { %v593_v59 = vsel %vm590_vm9, %v581_v54, %v583_v58 }
 0x4dd   :  { %v618_v60 = vmul.f32 %v604_v55, %v593_v59  ;;  %v2604_v55 = vld [vmem:[%s3337_s5 + $0x18] sm:$0xff] }
 0x4df   :  { %v3047_v62 = vpop.permute.xlu0 %1149  ;;  %811 = vmatprep.subr.mxu1 %v618_v60  ;;  %v587_v0 = vpop.permute.xlu1 %586 }
 0x4e0   :  { %v594_v1 = vsel %vm590_vm9, %v587_v0, %v581_v54  ;;  %v1155_v43 = vsel %vm1151_vm11, %v3047_v62, %v1144_v56 }
 0x4e1   :  { %v617_v2 = vmul.f32 %v600_v61, %v594_v1 }
 0x4e3   :  { %v3063_v8 = vpop.permute.xlu0 %1485  ;;  %812 = vmatpush1.msra.mxu1 %v617_v2  ;;  %v585_v9 = vpop.permute.xlu1 %584  ;;  %v639_v2 = vrot.slane %v3004_v37, %v3042_v57 }
 0x4e4   :  { %v591_v10 = vsel %vm590_vm9, %v585_v9, %v587_v0  ;;  %v592_v11 = vsel %vm590_vm9, %v583_v58, %v585_v9  ;;  %2599 = vmatmul.mubr.msk.f32.vlgmr.msra.gmra.mrb[2].mxu1 %vm662_vm8, %v621_v6 }
 0x4e5   :  { %v619_v12 = vmul.f32 %v608_v4, %v592_v11  ;;  %v620_v13 = vmul.f32 %v612_v5, %v591_v10  ;;  %946 = vmatprep.mubr.f32.mxu1 %v2756_v3  ;;  %v1504_v4 = vrot.slane %v3052_v63, %v3030_v51  ;;  %v1500_v10 = vrot.slane %v3052_v63, %v3042_v57 }
 0x4e7   :  { %v3074_v16 = vpop.permute.xlu0 %1483  ;;  %882 = vmatprep.subr.mxu1 %v620_v13  ;;  %v956_v18 = vpop.permute.xlu1 %955  ;;  %v3160_v13 = vmul.f32 %v3052_v63, %v3147_v7 }
 0x4e8   :  { %v964_v19 = vsel %vm961_vm10, %v954_v45, %v956_v18  ;;  %883 = vmatpush1.msra.mxu1 %v619_v12 }
 0x4e9   :  { %v989_v20 = vmul.f32 %v975_v14, %v964_v19  ;;  %2600 = vmatmul.mubr.msk.f32.vlgmr.msra.gmra.mrb[0].mxu1 %vm662_vm8, %v621_v6  ;;  %v1508_v19 = vrot.slane %v3052_v63, %v3009_v39 }
 0x4ea   :  { %1061 = vmatprep.mubr.f32.mxu1 %v2756_v3 }
 0x4eb   :  { %v3083_v24 = vpop.permute.xlu0 %1674  ;;  %997 = vmatprep.subr.mxu1 %v989_v20  ;;  %v958_v26 = vpop.permute.xlu1 %957  ;;  %v1694_v20 = vrot.slane %v1685_v17, %v3030_v51 }
 0x4ec   :  { %v962_v27 = vsel %vm961_vm10, %v958_v26, %v960_v53  ;;  %v963_v29 = vsel %vm961_vm10, %v956_v18, %v958_v26  ;;  %998 = vmatpush1.msra.mxu1 %v988_v23  ;;  %v1177_v53 = vmul.f32 %v1160_v40, %v1155_v43 }
 0x4ed   :  { %v990_v33 = vmul.f32 %v979_v21, %v963_v29  ;;  %v991_v34 = vmul.f32 %v983_v22, %v962_v27  ;;  %2602 = vmatmul.mubr.msk.f32.vlgmr.msra.gmra.mrb[2].mxu1 %vm662_vm8, %v2601_v25 }
 0x4ee   :  { %1132 = vmatprep.mubr.f32.mxu1 %v2756_v3 }
 0x4ef   :  { %v3099_v42 = vpop.permute.xlu0 %1672  ;;  %1068 = vmatprep.subr.mxu1 %v991_v34  ;;  %v1146_v44 = vpop.permute.xlu1 %1145  ;;  %v1702_v34 = vrot.slane %v1685_v17, %v2999_v36 }
 0x4f0   :  { %v1154_v45 = vsel %vm1151_vm11, %v1144_v56, %v1146_v44  ;;  %1069 = vmatpush1.msra.mxu1 %v990_v33  ;;  %v1683_v29 = vsel %vm1680_vm14, %v3099_v42, %v3083_v24 }
 0x4f1   :  { %v1178_v48 = vmul.f32 %v1164_v38, %v1154_v45  ;;  %2603 = vmatmul.mubr.msk.f32.vlgmr.msra.gmra.mrb[0].mxu1 %vm662_vm8, %v2601_v25  ;;  %v1690_v25 = vrot.slane %v1685_v17, %v3042_v57 }
 0x4f2   :  { %1250 = vmatprep.mubr.f32.mxu1 %v2756_v3 }
 0x4f3   :  { %v3112_v54 = vpop.permute.xlu0 %1864  ;;  %1186 = vmatprep.subr.mxu1 %v1178_v48  ;;  %v1148_v56 = vpop.permute.xlu1 %1147  ;;  %v1707_v43 = vmul.f32 %v1690_v25, %v1683_v29  ;;  %v1883_v48 = vrot.slane %v3147_v7, %v3030_v51 }
 0x4f4   :  { %v1152_v58 = vsel %vm1151_vm11, %v1148_v56, %v3047_v62  ;;  %v1153_v59 = vsel %vm1151_vm11, %v1146_v44, %v1148_v56  ;;  %1187 = vmatpush1.msra.mxu1 %v1177_v53  ;;  %v643_v62 = vrot.slane %v3004_v37, %v3030_v51  ;;  %v2607_v37 = vld [vmem:[%s3337_s5 + $0x20] sm:$0xff]  ;;  %v1698_v44 = vrot.slane %v1685_v17, %v3009_v39 }
 0x4f5   :  { %v1179_v60 = vmul.f32 %v1168_v49, %v1153_v59  ;;  %v1180_v61 = vmul.f32 %v1172_v50, %v1152_v58  ;;  %2605 = vmatmul.mubr.msk.f32.vlgmr.msra.gmra.mrb[2].mxu1 %vm662_vm8, %v2604_v55  ;;  %v2613_v49 = vld [vmem:[%s3337_s5 + $0x30] sm:$0xff]  ;;  %v1879_v53 = vrot.slane %v3147_v7, %v3042_v57  ;;  %v1891_v59 = vrot.slane %v3147_v7, %v2999_v36 }
 0x4f6   :  { %1321 = vmatprep.mubr.f32.mxu1 %v2756_v3 }
 0x4f7   :  { %v3124_v0 = vpop.permute.xlu0 %1862  ;;  %1257 = vmatprep.subr.mxu1 %v1180_v61  ;;  %v1488_v1 = vpop.permute.xlu1 %1487 }
 0x4f8   :  { %1258 = vmatpush1.msra.mxu1 %v1179_v60  ;;  %v1493_v5 = vsel %vm1491_vm12, %v3063_v8, %v1488_v1  ;;  %v1873_v56 = vsel %vm1870_vm15, %v3124_v0, %v3112_v54 }
 0x4f9   :  { %2606 = vmatmul.mubr.msk.f32.vlgmr.msra.gmra.mrb[0].mxu1 %vm662_vm8, %v2604_v55  ;;  %1337 = vmatprep.subr.mxu1 %v2963_v32  ;;  %v1518_v14 = vmul.f32 %v1504_v4, %v1493_v5  ;;  %v2073_v4 = vrot.slane %v3160_v13, %v3030_v51 }
 0x4fa   :  { %1338 = vmatpush1.msra.mxu1 %v2961_v31  ;;  %1401 = vmatprep.mubr.f32.mxu1 %v2756_v3 }
 0x4fb   :  { %v623_v6 = vpop.permute.xlu0 %622  ;;  %1408 = vmatprep.subr.mxu1 %v2955_v30  ;;  %v1490_v9 = vpop.permute.xlu1 %1489 }
 0x4fc   :  { %v633_v32 = vsel %vm630_vm7, %v623_v6, %v3023_v47  ;;  %v634_v31 = vsel %vm630_vm7, %v3011_v41, %v623_v6  ;;  %v1494_v47 = vsel %vm1491_vm12, %v3074_v16, %v3063_v8  ;;  %v1512_v41 = vrot.slane %v3052_v63, %v2999_v36 }
 0x4fd   :  { %v656_v11 = vmul.f32 %v639_v2, %v634_v31  ;;  %v657_v12 = vmul.f32 %v643_v62, %v633_v32  ;;  %2608 = vmatmul.mubr.msk.f32.vlgmr.msra.gmra.mrb[2].mxu1 %vm662_vm8, %v2607_v37  ;;  %v1495_v30 = vsel %vm1491_vm12, %v1490_v9, %v3074_v16  ;;  %v1517_v18 = vmul.f32 %v1500_v10, %v1494_v47 }
 0x4fe   :  { %1409 = vmatpush1.msra.mxu1 %v2953_v28  ;;  %1472 = vmatprep.mubr.f32.mxu1 %v2756_v3  ;;  %v2077_v28 = vrot.slane %v3160_v13, %v3009_v39  ;;  %v1492_v46 = vsel %vm1491_vm12, %v1488_v1, %v1490_v9  ;;  %v1520_v16 = vmul.f32 %v1512_v41, %v1495_v30 }
 0x4ff   :  { %666 = vmatprep.subr.mxu0 %v657_v12  ;;  %v3173_v15 = vpop.permute.xlu0 %2055  ;;  %1526 = vmatprep.subr.mxu1 %v1518_v14  ;;  %v1677_v8 = vpop.permute.xlu1 %1676  ;;  %v1519_v26 = vmul.f32 %v1508_v19, %v1492_v46  ;;  %v1896_v1 = vmul.f32 %v1879_v53, %v1873_v56  ;;  %v1887_v2 = vrot.slane %v3147_v7, %v3009_v39  ;;  %v2616_v39 = vld [vmem:[%s3337_s5 + $0x38] sm:$0xff] }
 0x500   :  { %667 = vmatpush1.msra.mxu0 %v656_v11  ;;  %v1682_v63 = vsel %vm1680_vm14, %v3083_v24, %v1677_v8  ;;  %v2081_v7 = vrot.slane %v3160_v13, %v2999_v36  ;;  %v2619_v36 = vld [vmem:[%s3337_s5 + $0x40] sm:$0xff] }
 0x501   :  { %2597 = vmatmul.mubr.msk.f32.vlgmr.msra.gmra.mrb[8].mxu0 %vm662_vm8, %v3035_v52  ;;  %2609 = vmatmul.mubr.msk.f32.vlgmr.msra.gmra.mrb[0].mxu1 %vm662_vm8, %v2607_v37  ;;  %v2610_v52 = vld [vmem:[%s3337_s5 + $0x28] sm:$0xff]  ;;  %v1708_v33 = vmul.f32 %v1694_v20, %v1682_v63  ;;  %v2069_v37 = vrot.slane %v3160_v13, %v3042_v57 }
 0x502   :  { %2368 = vmatprep.mubr.f32.mxu0 %v2756_v3  ;;  %1527 = vmatpush1.msra.mxu1 %v1517_v18 }
 0x503   :  { %v2058_v21 = vpop.permute.xlu0 %2057  ;;  %1590 = vmatprep.mubr.f32.mxu1 %v2756_v3  ;;  %1597 = vmatprep.subr.mxu1 %v1520_v16  ;;  %v1679_v23 = vpop.permute.xlu1 %1678 }
 0x504   :  { %v2060_v22 = vsel %vm2059_vm13, %v3173_v15, %v2058_v21  ;;  %v1684_v38 = vsel %vm1680_vm14, %v1679_v23, %v3099_v42  ;;  %v1681_v24 = vsel %vm1680_vm14, %v1677_v8, %v1679_v23  ;;  %v2274_v8 = vld [vmem:[%s3338_s10] sm:$0xff] }
 0x505   :  { %v3202_v27 = vmul.f32 %v2077_v28, %v2060_v22  ;;  %2611 = vmatmul.mubr.msk.f32.vlgmr.msra.gmra.mrb[2].mxu1 %vm662_vm8, %v2610_v52  ;;  %v1710_v45 = vmul.f32 %v1702_v34, %v1684_v38  ;;  %v1709_v55 = vmul.f32 %v1698_v44, %v1681_v24  ;;  %v2261_v34 = vld [vmem:[%s3339_s9] sm:$0xff] }
 0x506   :  { %1598 = vmatpush1.msra.mxu1 %v1519_v26  ;;  %1661 = vmatprep.mubr.f32.mxu1 %v2756_v3 }
 0x507   :  { %1716 = vmatprep.subr.mxu1 %v1708_v33  ;;  %v1867_v40 = vpop.permute.xlu1 %1866 }
 0x508   :  { %v1872_v42 = vsel %vm1870_vm15, %v3112_v54, %v1867_v40 }
 0x509   :  { %2612 = vmatmul.mubr.msk.f32.vlgmr.msra.gmra.mrb[0].mxu1 %vm662_vm8, %v2610_v52  ;;  %v1897_v58 = vmul.f32 %v1883_v48, %v1872_v42 }
 0x50a   :  { %1717 = vmatpush1.msra.mxu1 %v1707_v43  ;;  %1780 = vmatprep.mubr.f32.mxu1 %v2756_v3 }
 0x50b   :  { %1787 = vmatprep.subr.mxu1 %v1710_v45  ;;  %v1869_v50 = vpop.permute.xlu1 %1868 }
 0x50c   :  { %v1874_v60 = vsel %vm1870_vm15, %v1869_v50, %v3124_v0  ;;  %v1871_v54 = vsel %vm1870_vm15, %v1867_v40, %v1869_v50 }
 0x50d   :  { %2614 = vmatmul.mubr.msk.f32.vlgmr.msra.gmra.mrb[2].mxu1 %vm662_vm8, %v2613_v49  ;;  %v1899_v62 = vmul.f32 %v1891_v59, %v1874_v60  ;;  %v1898_v6 = vmul.f32 %v1887_v2, %v1871_v54  ;;  %v2296_v2 = vld [vmem:[%s3340_s6] sm:$0xff] }
 0x50e   :  { %1788 = vmatpush1.msra.mxu1 %v1709_v55  ;;  %1851 = vmatprep.mubr.f32.mxu1 %v2756_v3 }
 0x50f   :  { %1905 = vmatprep.subr.mxu1 %v1897_v58  ;;  %v2054_v61 = vpop.permute.xlu1 %2053 }
 0x510   :  { %v2061_v0 = vsel %vm2059_vm13, %v2054_v61, %v3173_v15 }
 0x511   :  { %2615 = vmatmul.mubr.msk.f32.vlgmr.msra.gmra.mrb[0].mxu1 %vm662_vm8, %v2613_v49  ;;  %v2087_v51 = vmul.f32 %v2073_v4, %v2061_v0  ;;  %v2297_v4 = vld [vmem:[%s3340_s6 + $0x8] sm:$0xff] }
 0x512   :  { %1906 = vmatpush1.msra.mxu1 %v1896_v1  ;;  %1969 = vmatprep.mubr.f32.mxu1 %v2756_v3 }
 0x513   :  { %1976 = vmatprep.subr.mxu1 %v1899_v62  ;;  %v2052_v5 = vpop.permute.xlu1 %2051 }
 0x514   :  { %v2062_v32 = vsel %vm2059_vm13, %v2052_v5, %v2054_v61  ;;  %v2063_v31 = vsel %vm2059_vm13, %v2058_v21, %v2052_v5 }
 0x515   :  { %2617 = vmatmul.mubr.msk.f32.vlgmr.msra.gmra.mrb[2].mxu1 %vm662_vm8, %v2616_v39  ;;  %v2086_v9 = vmul.f32 %v2069_v37, %v2062_v32  ;;  %v2089_v10 = vmul.f32 %v2081_v7, %v2063_v31 }
 0x516   :  { %1977 = vmatpush1.msra.mxu1 %v1898_v6  ;;  %2040 = vmatprep.mubr.f32.mxu1 %v2756_v3 }
 0x517   :  { %2095 = vmatprep.subr.mxu1 %v2087_v51 }
 0x519   :  { %2618 = vmatmul.mubr.msk.f32.vlgmr.msra.gmra.mrb[0].mxu1 %vm662_vm8, %v2616_v39 }
 0x51a   :  { %2096 = vmatpush1.msra.mxu1 %v2086_v9  ;;  %2159 = vmatprep.mubr.f32.mxu1 %v2756_v3 }
 0x51b   :  { %2166 = vmatprep.subr.mxu1 %v2089_v10 }
 0x51d   :  { %2620 = vmatmul.mubr.msk.f32.vlgmr.msra.gmra.mrb[2].mxu1 %vm662_vm8, %v2619_v36 }
 0x51e   :  { %2167 = vmatpush1.msra.mxu1 %v3202_v27  ;;  %2230 = vmatprep.mubr.f32.mxu1 %v2756_v3 }
 0x521   :  { %2621 = vmatmul.mubr.msk.f32.vlgmr.msra.gmra.mrb[0].mxu1 %vm662_vm8, %v2619_v36 }
 0x5d4   :  { %v732_v35 = vpop.f32.mrb[8].mxu0 }
 0x5d5   :  { %v734_v57 = vpop.f32.mrb[9].mxu0 }
 0x5f0   :  { %v2161_v11 = vpop.f32.mrb[2].mxu1 }
 0x5f1   :  { %v2696_v12 = vadd.f32 %v2161_v11, %v732_v35  ;;  %v2163_v13 = vpop.f32.mrb[3].mxu1 }
 0x5f2   :  { %v2697_v47 = vadd.f32 %v2163_v13, %v734_v57 }
 0x5f4   :  { %v2241_v14 = vadd.f32 %v2697_v47, %v2696_v12  ;;  %v2232_v41 = vpop.f32.mrb[0].mxu1 }
 0x5f5   :  { %v2234_v30 = vpop.f32.mrb[1].mxu1 }
 0x5f6   :  { %v2242_v15 = vadd.f32 %v2241_v14, %v2232_v41 }
 0x5f8   :  { %v2243_v17 = vadd.f32 %v2242_v15, %v2234_v30 }
 0x5fa   :  { %2244 = vadd.xlane.f32.xlu1 %v2243_v17 }
 0x60b   :  { %2277 = vperm.xlu1 %2744, %v2274_v8  }
 0x687   :  { %v2245_v18 = vpop.xlane.xlu1 %2244 }
 0x688   :  { %v2246_v19 = vmul.f32 0.001953125, %v2245_v18 }
 0x68a   :  { %v2247_v28 = vsub.f32 %v2696_v12, %v2246_v19  ;;  %v2248_v46 = vsub.f32 %v2697_v47, %v2246_v19  ;;  %v2249_v16 = vsub.f32 %v2232_v41, %v2246_v19  ;;  %v2250_v20 = vsub.f32 %v2234_v30, %v2246_v19 }
 0x68b   :  { %v2278_v42 = vpop.permute.xlu1 %2277 }
 0x68c   :  { %v2251_v63 = vmul.f32 %v2247_v28, %v2247_v28  ;;  %v2252_v21 = vmul.f32 %v2248_v46, %v2248_v46  ;;  %v2253_v52 = vmul.f32 %v2249_v16, %v2249_v16  ;;  %v2254_v23 = vmul.f32 %v2250_v20, %v2250_v20 }
 0x68e   :  { %v2255_v22 = vadd.f32 %v2252_v21, %v2251_v63 }
 0x690   :  { %v2256_v25 = vadd.f32 %v2255_v22, %v2253_v52 }
 0x692   :  { %v2257_v26 = vadd.f32 %v2256_v25, %v2254_v23 }
 0x694   :  { %2258 = vadd.xlane.f32.xlu0 %v2257_v26 }
 0x721   :  { %v2259_v27 = vpop.xlane.xlu0 %2258 }
 0x722   :  { %v2260_v29 = vmul.f32 0.001953125, %v2259_v27 }
 0x724   :  { %v2262_v33 = vadd.f32 1e-05, %v2260_v29 }
 0x726   :  { %2748 = vrsqrt.f32 %v2262_v33 }
 0x730   :  { %v2749_v38 = vpop.eup %2748 }
 0x731   :  { %v2264_v40 = vmul.f32 %v2749_v38, %v2261_v34 }
 0x733   :  { %2267 = vperm.xlu0 %2745, %v2264_v40  }
 0x7b2   :  { %v2268_v43 = vpop.permute.xlu0 %2267 }
 0x7b3   :  { %v2270_v44 = vmul.f32 %v2268_v43, %v2247_v28  ;;  %v2271_v24 = vmul.f32 %v2268_v43, %v2248_v46  ;;  %v2272_v45 = vmul.f32 %v2268_v43, %v2249_v16  ;;  %v2273_v48 = vmul.f32 %v2268_v43, %v2250_v20 }
 0x7b5   :  { %v2280_v49 = vadd.f32 %v2278_v42, %v2270_v44  ;;  %v2282_v50 = vadd.f32 %v2278_v42, %v2272_v45  ;;  %v2281_v53 = vadd.f32 %v2278_v42, %v2271_v24  ;;  %v2283_v55 = vadd.f32 %v2278_v42, %v2273_v48  ;;  %v2498_v24 = vld [vmem:[%s3341_s11] sm:$0xff]  ;;  %v2499_v42 = vld [vmem:[%s3341_s11 + $0x8] sm:$0xff] }
 0x7b7   :  { %vm2285_vm0 = vcmp.gt.f32.partialorder %v2281_v53, 0.0  ;;  %v2289_v56 = vmul.f32 0.1, %v2281_v53  ;;  %vm2284_vm1 = vcmp.gt.f32.partialorder %v2280_v49, 0.0  ;;  %v2288_v58 = vmul.f32 0.1, %v2280_v49 }
 0x7b8   :  { %vm2287_vm2 = vcmp.gt.f32.partialorder %v2283_v55, 0.0  ;;  %v2291_v59 = vmul.f32 0.1, %v2283_v55  ;;  %v2290_v60 = vmul.f32 0.1, %v2282_v50  ;;  %vm2286_vm3 = vcmp.gt.f32.partialorder %v2282_v50, 0.0 }
 0x7b9   :  { %v2293_v61 = vsel %vm2285_vm0, %v2281_v53, %v2289_v56  ;;  %v2292_v1 = vsel %vm2284_vm1, %v2280_v49, %v2288_v58 }
 0x7ba   :  { %2304 = vmatprep.subr.mxu0 %v2293_v61  ;;  %v2295_v54 = vsel %vm2287_vm2, %v2283_v55, %v2291_v59  ;;  %v2294_v62 = vsel %vm2286_vm3, %v2282_v50, %v2290_v60  ;;  %v2524_v50 = vld [vmem:[%s3342_s12] sm:$0xff]  ;;  %v2525_v55 = vld [vmem:[%s3342_s12 + $0x8] sm:$0xff] }
 0x7bb   :  { %2305 = vmatpush1.msra.mxu0 %v2292_v1 }
 0x7bc   :  { %2622 = vmatmul.mubr.msk.f32.vlgmr.msra.gmra.mrb[10].mxu0 %vm662_vm8, %v2296_v2  ;;  %2381 = vmatprep.subr.mxu0 %v2295_v54 }
 0x7bd   :  { %2382 = vmatpush1.msra.mxu0 %v2294_v62  ;;  %2374 = vmatprep.mubr.f32.mxu0 %v2756_v3 }
 0x7c0   :  { %2623 = vmatmul.mubr.msk.f32.gmra.mrb[12].mxu0 %vm662_vm8, %v2297_v4 }
 0x7c1   :  { %2445 = vmatprep.mubr.f32.mxu0 %v2756_v3 }
 0x7c4   :  { %2624 = vmatmul.mubr.msk.f32.vlgmr.msra.gmra.mrb[14].mxu0 %vm662_vm8, %v2296_v2 }
 0x7c5   :  { %2451 = vmatprep.mubr.f32.mxu0 %v2756_v3 }
 0x7c8   :  { %2625 = vmatmul.mubr.msk.f32.gmra.mrb[16].mxu0 %vm662_vm8, %v2297_v4 }
 0x88f   :  { %v2370_v0 = vpop.f32.mrb[10].mxu0 }
 0x890   :  { %v2372_v39 = vpop.f32.mrb[11].mxu0 }
 0x891   :  { %v2458_v5 = vadd.f32 %v2372_v39, %v2370_v0 }
 0x893   :  { %v2376_v6 = vpop.f32.mrb[12].mxu0 }
 0x894   :  { %v2378_v37 = vpop.f32.mrb[13].mxu0 }
 0x895   :  { %v2463_v51 = vadd.f32 %v2378_v37, %v2376_v6 }
 0x897   :  { %v2447_v7 = vpop.f32.mrb[14].mxu0 }
 0x898   :  { %v2459_v32 = vadd.f32 %v2458_v5, %v2447_v7  ;;  %v2449_v31 = vpop.f32.mrb[15].mxu0 }
 0x89a   :  { %v2460_v9 = vadd.f32 %v2459_v32, %v2449_v31 }
 0x89b   :  { %v2453_v10 = vpop.f32.mrb[16].mxu0 }
 0x89c   :  { %v2464_v36 = vadd.f32 %v2463_v51, %v2453_v10  ;;  %2461 = vadd.xlane.f32.xlu1 %v2460_v9  ;;  %v2455_v35 = vpop.f32.mrb[17].mxu0 }
 0x89e   :  { %v2465_v57 = vadd.f32 %v2464_v36, %v2455_v35 }
 0x8a0   :  { %2466 = vadd.xlane.f32.xlu0 %v2465_v57 }
 0x929   :  { %v2462_v11 = vpop.xlane.xlu1 %2461 }
 0x92a   :  { %v2468_v3 = vmul.f32 0.001953125, %v2462_v11 }
 0x92c   :  { %v2470_v12 = vsub.f32 %v2370_v0, %v2468_v3  ;;  %v2471_v13 = vsub.f32 %v2372_v39, %v2468_v3  ;;  %v2472_v47 = vsub.f32 %v2447_v7, %v2468_v3  ;;  %v2473_v41 = vsub.f32 %v2449_v31, %v2468_v3 }
 0x92d   :  { %v2467_v14 = vpop.xlane.xlu0 %2466 }
 0x92e   :  { %v2469_v30 = vmul.f32 0.001953125, %v2467_v14  ;;  %v2478_v15 = vmul.f32 %v2470_v12, %v2470_v12  ;;  %v2479_v17 = vmul.f32 %v2471_v13, %v2471_v13  ;;  %v2480_v8 = vmul.f32 %v2472_v47, %v2472_v47 }
 0x92f   :  { %v2481_v16 = vmul.f32 %v2473_v41, %v2473_v41 }
 0x930   :  { %v2474_v18 = vsub.f32 %v2376_v6, %v2469_v30  ;;  %v2475_v19 = vsub.f32 %v2378_v37, %v2469_v30  ;;  %v2486_v28 = vadd.f32 %v2479_v17, %v2478_v15  ;;  %v2476_v46 = vsub.f32 %v2453_v10, %v2469_v30 }
 0x931   :  { %v2477_v63 = vsub.f32 %v2455_v35, %v2469_v30 }
 0x932   :  { %v2487_v20 = vadd.f32 %v2486_v28, %v2480_v8  ;;  %v2482_v21 = vmul.f32 %v2474_v18, %v2474_v18  ;;  %v2483_v52 = vmul.f32 %v2475_v19, %v2475_v19  ;;  %v2484_v23 = vmul.f32 %v2476_v46, %v2476_v46 }
 0x933   :  { %v2485_v26 = vmul.f32 %v2477_v63, %v2477_v63 }
 0x934   :  { %v2488_v22 = vadd.f32 %v2487_v20, %v2481_v16  ;;  %v2491_v25 = vadd.f32 %v2483_v52, %v2482_v21 }
 0x936   :  { %2489 = vadd.xlane.f32.xlu1 %v2488_v22  ;;  %v2492_v27 = vadd.f32 %v2491_v25, %v2484_v23 }
 0x938   :  { %v2493_v29 = vadd.f32 %v2492_v27, %v2485_v26 }
 0x93a   :  { %2494 = vadd.xlane.f32.xlu1 %v2493_v29 }
 0x9c3   :  { %v2490_v33 = vpop.xlane.xlu1 %2489 }
 0x9c4   :  { %v2496_v34 = vmul.f32 0.001953125, %v2490_v33 }
 0x9c6   :  { %v2500_v38 = vadd.f32 1e-05, %v2496_v34 }
 0x9c7   :  { %v2495_v40 = vpop.xlane.xlu1 %2494 }
 0x9c8   :  { %2750 = vrsqrt.f32 %v2500_v38  ;;  %v2497_v43 = vmul.f32 0.001953125, %v2495_v40 }
 0x9ca   :  { %v2501_v44 = vadd.f32 1e-05, %v2497_v43 }
 0x9cc   :  { %2752 = vrsqrt.f32 %v2501_v44 }
 0x9d2   :  { %v2751_v45 = vpop.eup %2750 }
 0x9d3   :  { %v2504_v48 = vmul.f32 %v2751_v45, %v2498_v24 }
 0x9d5   :  { %2508 = vperm.xlu1 %2744, %v2504_v48  }
 0x9d6   :  { %v2753_v49 = vpop.eup %2752 }
 0x9d7   :  { %v2505_v53 = vmul.f32 %v2753_v49, %v2499_v42 }
 0x9d9   :  { %2528 = vperm.xlu1 %2744, %v2524_v50   ;;  %2513 = vperm.xlu0 %2745, %v2505_v53  }
 0x9dd   :  { %2533 = vperm.xlu1 %2744, %v2525_v55  }
 0xa54   :  { %v2509_v56 = vpop.permute.xlu1 %2508 }
 0xa55   :  { %v2516_v58 = vmul.f32 %v2509_v56, %v2470_v12  ;;  %v2517_v59 = vmul.f32 %v2509_v56, %v2471_v13  ;;  %v2518_v60 = vmul.f32 %v2509_v56, %v2472_v47  ;;  %v2519_v61 = vmul.f32 %v2509_v56, %v2473_v41 }
 0xa58   :  { %v2514_v1 = vpop.permute.xlu0 %2513  ;;  %v2529_v2 = vpop.permute.xlu1 %2528 }
 0xa59   :  { %v2536_v54 = vadd.f32 %v2529_v2, %v2516_v58  ;;  %v2537_v62 = vadd.f32 %v2529_v2, %v2517_v59  ;;  %v2538_v4 = vadd.f32 %v2529_v2, %v2518_v60  ;;  %v2539_v0 = vadd.f32 %v2529_v2, %v2519_v61 }
 0xa5a   :  { %v2520_v39 = vmul.f32 %v2514_v1, %v2474_v18  ;;  %v2521_v5 = vmul.f32 %v2514_v1, %v2475_v19  ;;  %v2522_v6 = vmul.f32 %v2514_v1, %v2476_v46  ;;  %v2523_v37 = vmul.f32 %v2514_v1, %v2477_v63 }
 0xa5b   :  { %vm2544_vm4 = vcmp.gt.f32.partialorder %v2536_v54, 0.0  ;;  %vm2545_vm5 = vcmp.gt.f32.partialorder %v2537_v62, 0.0  ;;  %vm2546_vm6 = vcmp.gt.f32.partialorder %v2538_v4, 0.0  ;;  %vm2547_vm7 = vcmp.gt.f32.partialorder %v2539_v0, 0.0 }
 0xa5c   :  { %v2534_v51 = vpop.permute.xlu1 %2533  ;;  %v2552_v7 = vmul.f32 0.1, %v2536_v54  ;;  %v2553_v32 = vmul.f32 0.1, %v2537_v62  ;;  %v2554_v31 = vmul.f32 0.1, %v2538_v4 }
 0xa5d   :  { %v2540_v9 = vadd.f32 %v2534_v51, %v2520_v39  ;;  %v2555_v10 = vmul.f32 0.1, %v2539_v0  ;;  %v2541_v36 = vadd.f32 %v2534_v51, %v2521_v5  ;;  %v2542_v35 = vadd.f32 %v2534_v51, %v2522_v6 }
 0xa5e   :  { %v2543_v57 = vadd.f32 %v2534_v51, %v2523_v37  ;;  %v2560_v11 = vsel %vm2544_vm4, %v2536_v54, %v2552_v7  ;;  %v2561_v3 = vsel %vm2545_vm5, %v2537_v62, %v2553_v32  ;;  %v2562_v12 = vsel %vm2546_vm6, %v2538_v4, %v2554_v31 }
 0xa5f   :  { %vm2548_vm8 = vcmp.gt.f32.partialorder %v2540_v9, 0.0  ;;  %v2563_v13 = vsel %vm2547_vm7, %v2539_v0, %v2555_v10  ;;  %2568 = vst [vmem:[%s3343_s14] sm:$0xff] %v2560_v11  ;;  %2569 = vst [vmem:[%s3343_s14 + $0x8] sm:$0xff] %v2561_v3  ;;  %vm2549_vm9 = vcmp.gt.f32.partialorder %v2541_v36, 0.0  ;;  %vm2550_vm10 = vcmp.gt.f32.partialorder %v2542_v35, 0.0 }
 0xa60   :  { %2626 = vst [vmem:[%s3343_s14 + $0x20] sm:$0xff] %v2562_v12  ;;  %vm2551_vm11 = vcmp.gt.f32.partialorder %v2543_v57, 0.0  ;;  %2627 = vst [vmem:[%s3343_s14 + $0x28] sm:$0xff] %v2563_v13  ;;  %v2556_v47 = vmul.f32 0.1, %v2540_v9 }
 0xa61   :  { %v2557_v14 = vmul.f32 0.1, %v2541_v36  ;;  %v2558_v41 = vmul.f32 0.1, %v2542_v35  ;;  %v2559_v30 = vmul.f32 0.1, %v2543_v57 }
 0xa62   :  { %v2564_v15 = vsel %vm2548_vm8, %v2540_v9, %v2556_v47 }
 0xa63   :  { %v2565_v17 = vsel %vm2549_vm9, %v2541_v36, %v2557_v14  ;;  %v2566_v8 = vsel %vm2550_vm10, %v2542_v35, %v2558_v41  ;;  %v2567_v18 = vsel %vm2551_vm11, %v2543_v57, %v2559_v30  ;;  %2570 = vst [vmem:[%s3343_s14 + $0x10] sm:$0xff] %v2564_v15 }
 0xa64   :  { %2571 = vst [vmem:[%s3343_s14 + $0x18] sm:$0xff] %v2565_v17  ;;  %2628 = vst [vmem:[%s3343_s14 + $0x30] sm:$0xff] %v2566_v8 }
 0xa65   :  { %2629 = vst [vmem:[%s3343_s14 + $0x38] sm:$0xff] %v2567_v18 }

</bundles_post_ra>
